<compile_context>
chip_gen: v5e
topology: v5e:2x2
jax: 0.10.0
libtpu: 0.0.40
codegen_flags: <defaults>
</compile_context>

<pallas_src>
import math
import jax
import jax.numpy as jnp
from jax import lax
from jax.experimental import pallas as pl
from jax.experimental.pallas import tpu as pltpu

# ---------------- synthetic encoder / head configuration ----------------
IMG = 16          # H = W
IN_CH = 3
PATCH = 8         # -> 2x2 = 4 patches
EMBED = 32
HEADS = 2
HEAD_DIM = EMBED // HEADS
MLP_HIDDEN = 64
DEPTH = 2
NUM_CLASSES = 10
HEAD_PAD = 128    # lane-dense padded head width (sliced back to NUM_CLASSES)
N_PATCHES = (IMG // PATCH) ** 2
N_TOKENS = N_PATCHES + 1            # + cls token
TOK_PAD = 8                         # sublane-aligned tokens per batch (3 pad rows)
TOK_SHIFT = 3                       # log2(TOK_PAD)
PATCH_DIM = PATCH * PATCH * IN_CH   # 192
LANES = 128
LN_EPS = 1e-5

# ---------------- packed bf16 weight-slab layout (rows x 128 lanes) ----------------
W_PATCH_OFF = 0                         # [PATCH_DIM, EMBED]
BLK_W_OFF = PATCH_DIM                   # per-block weight region start
WO_OFF = HEADS * 3 * EMBED              # 192  (after HEADS * (wq|wk|wv) of EMBED rows each)
W1_OFF = WO_OFF + EMBED                 # 224
W2_OFF = W1_OFF + EMBED                 # 256
BLK_W_ROWS = W2_OFF + MLP_HIDDEN        # 320
W_HEAD_OFF = BLK_W_OFF + DEPTH * BLK_W_ROWS   # 832
W_ROWS = W_HEAD_OFF + EMBED             # 864 (multiple of 16 -> bf16 sublane tile OK)

# ---------------- packed f32 vector-slab layout (rows x 128 lanes) ----------------
TOKADD_OFF = 0                          # [TOK_PAD, EMBED]: cls+pos / pos+b_patch / 0
LNF_G_ROW = 8
LNF_B_ROW = 9
B_HEAD_ROW = 10
BLK_V_OFF = 16
BLK_V_ROWS = 16
V_LN1_G, V_LN1_B = 0, 1
V_BQ, V_BK, V_BV = 2, 4, 6              # + head index
V_BO, V_LN2_G, V_LN2_B, V_B1, V_B2 = 8, 9, 10, 11, 12
V_ROWS = BLK_V_OFF + DEPTH * BLK_V_ROWS  # 48 (multiple of 8)


# ---------------- helpers used inside the kernel ----------------
def _layernorm(x, g, b, eps=LN_EPS):
    mu = jnp.mean(x, axis=-1, keepdims=True)
    var = jnp.mean((x - mu) ** 2, axis=-1, keepdims=True)
    return (x - mu) * lax.rsqrt(var + eps) * g + b


def _mm(a_f32, w_bf16):
    # bf16 operands, f32 accumulation (MXU-native on every TPU generation).
    return jnp.dot(a_f32.astype(jnp.bfloat16), w_bf16,
                   preferred_element_type=jnp.float32)


# ---------------- single fused kernel: full forward pass ----------------
def _make_kernel(batch, out_rows):
    BN = batch * TOK_PAD
    scale = 1.0 / math.sqrt(HEAD_DIM)

    def kernel(patches_ref, wslab_ref, vslab_ref, out_ref):
        f32 = jnp.float32
        bf16 = jnp.bfloat16

        # --- patch embedding straight into the padded token layout ---
        # patches_ref rows: per 8-row batch group: [0]=cls slot (zeros),
        # [1..4]=patches, [5..7]=pad (zeros).
        w_patch = wslab_ref[W_PATCH_OFF:W_PATCH_OFF + PATCH_DIM, 0:EMBED]     # bf16
        emb = _mm(patches_ref[...], w_patch)                                  # [BN, D]
        tok_add = vslab_ref[TOKADD_OFF:TOKADD_OFF + TOK_PAD, 0:EMBED]         # [8, D]
        x = emb + jnp.concatenate([tok_add] * batch, axis=0)                  # [BN, D]

        # --- block-diagonal attention mask; pad token columns masked out ---
        col_idx = lax.broadcasted_iota(jnp.int32, (BN, BN), 1)
        row_grp = lax.broadcasted_iota(jnp.int32, (BN, BN), 0) >> TOK_SHIFT
        attn_mask = (row_grp == (col_idx >> TOK_SHIFT)) & \
                    ((col_idx & (TOK_PAD - 1)) < N_TOKENS)
        neg_big = f32(-1e30)

        # --- encoder blocks (static unroll over DEPTH) ---
        for d in range(DEPTH):
            wb = BLK_W_OFF + d * BLK_W_ROWS
            vb = BLK_V_OFF + d * BLK_V_ROWS

            ln1_g = vslab_ref[vb + V_LN1_G:vb + V_LN1_G + 1, 0:EMBED]
            ln1_b = vslab_ref[vb + V_LN1_B:vb + V_LN1_B + 1, 0:EMBED]
            h = _layernorm(x, ln1_g, ln1_b)
            h_bf = h.astype(bf16)

            heads_out = []
            for hh in range(HEADS):                       # static, 2 heads
                qo = wb + hh * 3 * EMBED                  # per-head weight rows
                wq = wslab_ref[qo:qo + EMBED, 0:HEAD_DIM]
                wk = wslab_ref[qo + EMBED:qo + 2 * EMBED, 0:HEAD_DIM]
                wv = wslab_ref[qo + 2 * EMBED:qo + 3 * EMBED, 0:HEAD_DIM]
                bq = vslab_ref[vb + V_BQ + hh:vb + V_BQ + hh + 1, 0:HEAD_DIM]
                bk = vslab_ref[vb + V_BK + hh:vb + V_BK + hh + 1, 0:HEAD_DIM]
                bv = vslab_ref[vb + V_BV + hh:vb + V_BV + hh + 1, 0:HEAD_DIM]

                q = jnp.dot(h_bf, wq, preferred_element_type=f32) + bq        # [BN, HD]
                k = jnp.dot(h_bf, wk, preferred_element_type=f32) + bk
                v = jnp.dot(h_bf, wv, preferred_element_type=f32) + bv

                # q @ k.T without materializing a transpose
                s = lax.dot_general(
                    q.astype(bf16), k.astype(bf16),
                    dimension_numbers=(((1,), (1,)), ((), ())),
                    preferred_element_type=f32) * scale
                s = jnp.where(attn_mask, s, neg_big)
                s = s - jnp.max(s, axis=-1, keepdims=True)
                p = jnp.exp(s)
                p = p * pl.reciprocal(jnp.sum(p, axis=-1, keepdims=True),
                                      approx=True)
                heads_out.append(jnp.dot(p.astype(bf16), v.astype(bf16),
                                         preferred_element_type=f32))         # [BN, HD]

            o_cat = jnp.concatenate(heads_out, axis=1)                        # [BN, D]
            wo = wslab_ref[wb + WO_OFF:wb + WO_OFF + EMBED, 0:EMBED]
            bo = vslab_ref[vb + V_BO:vb + V_BO + 1, 0:EMBED]
            x = x + _mm(o_cat, wo) + bo

            ln2_g = vslab_ref[vb + V_LN2_G:vb + V_LN2_G + 1, 0:EMBED]
            ln2_b = vslab_ref[vb + V_LN2_B:vb + V_LN2_B + 1, 0:EMBED]
            h2 = _layernorm(x, ln2_g, ln2_b)
            w1 = wslab_ref[wb + W1_OFF:wb + W1_OFF + EMBED, 0:MLP_HIDDEN]
            b1 = vslab_ref[vb + V_B1:vb + V_B1 + 1, 0:MLP_HIDDEN]
            # TODO(synk): torch.nn.GELU defaults to exact erf; tanh approximation
            # used here for guaranteed Mosaic lowering (~1e-3 deviation).
            m = jax.nn.gelu(_mm(h2, w1) + b1, approximate=True)
            w2 = wslab_ref[wb + W2_OFF:wb + W2_OFF + MLP_HIDDEN, 0:EMBED]
            b2 = vslab_ref[vb + V_B2:vb + V_B2 + 1, 0:EMBED]
            x = x + _mm(m, w2) + b2

        # --- final LN + token mean-pool (dim=1, real tokens only) + head ---
        ln_g = vslab_ref[LNF_G_ROW:LNF_G_ROW + 1, 0:EMBED]
        ln_b = vslab_ref[LNF_B_ROW:LNF_B_ROW + 1, 0:EMBED]
        xf = _layernorm(x, ln_g, ln_b)

        pr = lax.broadcasted_iota(jnp.int32, (out_rows, BN), 0)
        pc = lax.broadcasted_iota(jnp.int32, (out_rows, BN), 1)
        pool = jnp.where((pr == (pc >> TOK_SHIFT)) &
                         ((pc & (TOK_PAD - 1)) < N_TOKENS),
                         f32(1.0), f32(0.0))
        pooled = jnp.dot(pool.astype(bf16), xf.astype(bf16),
                         preferred_element_type=f32) * f32(1.0 / N_TOKENS)    # [8, D]

        w_head = wslab_ref[W_HEAD_OFF:W_HEAD_OFF + EMBED, 0:HEAD_PAD]
        b_head = vslab_ref[B_HEAD_ROW:B_HEAD_ROW + 1, 0:HEAD_PAD]
        logits = _mm(pooled, w_head) + b_head                                 # [8, 128]
        out_ref[...] = logits.astype(out_ref.dtype)

    return kernel


# ---------------- full forward (== FullModel.forward with mask_ratio = 0) ----------------
def full_model_forward(x, params):
    # glue: NCHW image -> flattened non-overlapping patches in the padded
    # (8 tokens-per-batch) layout the kernel expects.
    B, C, H, W = x.shape
    ph, pw = H // PATCH, W // PATCH
    p = x.reshape(B, C, ph, PATCH, pw, PATCH).transpose(0, 2, 4, 3, 5, 1)
    patches = p.reshape(B, ph * pw, PATCH * PATCH * C).astype(jnp.float32)
    patches_padded = jnp.pad(patches, ((0, 0), (1, TOK_PAD - 1 - N_PATCHES), (0, 0)))
    patches_padded = patches_padded.reshape(B * TOK_PAD, PATCH_DIM)

    out_rows = max(8, -(-B // 8) * 8)   # full (8,128) output tile
    out = pl.pallas_call(
        _make_kernel(B, out_rows),
        out_shape=jax.ShapeDtypeStruct((out_rows, HEAD_PAD), jnp.float32),
        in_specs=[pl.BlockSpec(memory_space=pltpu.MemorySpace.VMEM)] * 3,
        out_specs=pl.BlockSpec(memory_space=pltpu.MemorySpace.VMEM),
    )(patches_padded, params["wslab"], params["vslab"])
    return out[:B, :NUM_CLASSES]


# ---------------- parameter init (deterministic, synthetic, pre-packed slabs) ----------------
def init_params(key):
    keys = jax.random.split(key, 4 + DEPTH)
    w_patch = 0.02 * jax.random.normal(keys[0], (PATCH_DIM, EMBED), jnp.float32)
    cls = 0.02 * jax.random.normal(keys[1], (EMBED,), jnp.float32)
    pos = 0.02 * jax.random.normal(keys[2], (N_TOKENS, EMBED), jnp.float32)
    w_head = 0.02 * jax.random.normal(keys[3], (EMBED, NUM_CLASSES), jnp.float32)
    b_patch = jnp.zeros((EMBED,), jnp.float32)

    # ---- bf16 matmul-weight slab ----
    wslab = jnp.zeros((W_ROWS, LANES), jnp.float32)
    wslab = wslab.at[W_PATCH_OFF:W_PATCH_OFF + PATCH_DIM, 0:EMBED].set(w_patch)

    # ---- f32 vector slab (LN params, biases, cls/pos additive table) ----
    vslab = jnp.zeros((V_ROWS, LANES), jnp.float32)
    tok_add = jnp.zeros((TOK_PAD, EMBED), jnp.float32)
    tok_add = tok_add.at[0].set(cls + pos[0])
    tok_add = tok_add.at[1:1 + N_PATCHES].set(pos[1:] + b_patch)
    vslab = vslab.at[TOKADD_OFF:TOKADD_OFF + TOK_PAD, 0:EMBED].set(tok_add)
    vslab = vslab.at[LNF_G_ROW, 0:EMBED].set(1.0)      # final LN gamma
    # final LN beta, head bias stay zero (rows already zero)

    for d in range(DEPTH):
        bk = jax.random.split(keys[4 + d], 4)
        wqkv = 0.02 * jax.random.normal(bk[0], (EMBED, 3 * EMBED), jnp.float32)
        wo = 0.02 * jax.random.normal(bk[1], (EMBED, EMBED), jnp.float32)
        w1 = 0.02 * jax.random.normal(bk[2], (EMBED, MLP_HIDDEN), jnp.float32)
        w2 = 0.02 * jax.random.normal(bk[3], (MLP_HIDDEN, EMBED), jnp.float32)

        wb = BLK_W_OFF + d * BLK_W_ROWS
        for hh in range(HEADS):                         # head-major per-head Wq/Wk/Wv
            lo = hh * HEAD_DIM
            qo = wb + hh * 3 * EMBED
            wslab = wslab.at[qo:qo + EMBED, 0:HEAD_DIM].set(
                wqkv[:, lo:lo + HEAD_DIM])
            wslab = wslab.at[qo + EMBED:qo + 2 * EMBED, 0:HEAD_DIM].set(
                wqkv[:, EMBED + lo:EMBED + lo + HEAD_DIM])
            wslab = wslab.at[qo + 2 * EMBED:qo + 3 * EMBED, 0:HEAD_DIM].set(
                wqkv[:, 2 * EMBED + lo:2 * EMBED + lo + HEAD_DIM])
        wslab = wslab.at[wb + WO_OFF:wb + WO_OFF + EMBED, 0:EMBED].set(wo)
        wslab = wslab.at[wb + W1_OFF:wb + W1_OFF + EMBED, 0:MLP_HIDDEN].set(w1)
        wslab = wslab.at[wb + W2_OFF:wb + W2_OFF + MLP_HIDDEN, 0:EMBED].set(w2)

        vb = BLK_V_OFF + d * BLK_V_ROWS
        vslab = vslab.at[vb + V_LN1_G, 0:EMBED].set(1.0)
        vslab = vslab.at[vb + V_LN2_G, 0:EMBED].set(1.0)
        # qkv / proj / mlp biases are zero in this synthetic init (rows already zero)

    wslab = wslab.at[W_HEAD_OFF:W_HEAD_OFF + EMBED, 0:NUM_CLASSES].set(w_head)
    return {"wslab": wslab.astype(jnp.bfloat16), "vslab": vslab}


if __name__ == "__main__":
    key = jax.random.PRNGKey(0)
    x = jax.random.normal(key, (2, IN_CH, IMG, IMG), jnp.float32)   # NCHW like PyTorch
    params = init_params(jax.random.PRNGKey(1))
    fwd = jax.jit(full_model_forward)
    out = jax.block_until_ready(fwd(x, params))
    assert out.shape == (2, NUM_CLASSES) and out.dtype == jnp.float32
    assert bool(jnp.all(jnp.isfinite(out)))
    print("KERNEL_OK")
</pallas_src>

<mosaic_0001>
module attributes {stable_mosaic.version = 11 : i64} {
  func.func @kernel(%arg0: memref<16x192xf32, #tpu.memory_space<vmem>>, %arg1: memref<864x128xbf16, #tpu.memory_space<vmem>>, %arg2: memref<48x128xf32, #tpu.memory_space<vmem>>, %arg3: memref<8x128xf32, #tpu.memory_space<vmem>>) attributes {dimension_semantics = [], scalar_prefetch = 0 : i64, scratch_operands = 0 : i64, tpu.core_type = #tpu.core_type<tc>} {
    %c0 = arith.constant 0 : index
    %c0_0 = arith.constant 0 : index
    %0 = vector.load %arg1[%c0, %c0_0] : memref<864x128xbf16, #tpu.memory_space<vmem>>, vector<192x32xbf16>
    %c0_1 = arith.constant 0 : index
    %c0_2 = arith.constant 0 : index
    %1 = vector.load %arg0[%c0_1, %c0_2] : memref<16x192xf32, #tpu.memory_space<vmem>>, vector<16x192xf32>
    %2 = arith.truncf %1 : vector<16x192xf32> to vector<16x192xbf16>
    %cst = arith.constant dense<0.000000e+00> : vector<16x32xf32>
    %3 = tpu.matmul %2, %0, %cst {dimension_numbers = #tpu.dot_dimension_numbers<[1], [0], [0], [1], [0, 0, 1, 1], [], []>} : vector<16x192xbf16>, vector<192x32xbf16>, vector<16x32xf32> -> vector<16x32xf32>
    %c0_3 = arith.constant 0 : index
    %c0_4 = arith.constant 0 : index
    %4 = vector.load %arg2[%c0_3, %c0_4] : memref<48x128xf32, #tpu.memory_space<vmem>>, vector<8x32xf32>
    %5 = tpu.concatenate %4, %4 in 0 : vector<8x32xf32>, vector<8x32xf32> -> vector<16x32xf32>
    %6 = arith.addf %3, %5 : vector<16x32xf32>
    %7 = tpu.iota {dimensions = array<i32: 1>} : vector<16x16xi32>
    %8 = tpu.iota {dimensions = array<i32: 0>} : vector<16x16xi32>
    %c3_i32 = arith.constant 3 : i32
    %9 = vector.broadcast %c3_i32 : i32 to vector<16x16xi32>
    %10 = arith.shrsi %8, %9 : vector<16x16xi32>
    %c3_i32_5 = arith.constant 3 : i32
    %11 = vector.broadcast %c3_i32_5 : i32 to vector<16x16xi32>
    %12 = arith.shrsi %7, %11 : vector<16x16xi32>
    %13 = arith.cmpi eq, %10, %12 : vector<16x16xi32>
    %c7_i32 = arith.constant 7 : i32
    %14 = vector.broadcast %c7_i32 : i32 to vector<16x16xi32>
    %15 = arith.andi %7, %14 : vector<16x16xi32>
    %c5_i32 = arith.constant 5 : i32
    %16 = vector.broadcast %c5_i32 : i32 to vector<16x16xi32>
    %17 = arith.cmpi slt, %15, %16 : vector<16x16xi32>
    %18 = arith.andi %13, %17 : vector<16x16xi1>
    %c16 = arith.constant 16 : index
    %c0_6 = arith.constant 0 : index
    %19 = vector.load %arg2[%c16, %c0_6] : memref<48x128xf32, #tpu.memory_space<vmem>>, vector<1x32xf32>
    %c17 = arith.constant 17 : index
    %c0_7 = arith.constant 0 : index
    %20 = vector.load %arg2[%c17, %c0_7] : memref<48x128xf32, #tpu.memory_space<vmem>>, vector<1x32xf32>
    %cst_8 = arith.constant dense<0.000000e+00> : vector<16xf32>
    %21 = vector.multi_reduction <add>, %6, %cst_8 [1] : vector<16x32xf32> to vector<16xf32>
    %22 = vector.shape_cast %21 : vector<16xf32> to vector<16x1xf32>
    %cst_9 = arith.constant 3.200000e+01 : f32
    %23 = vector.broadcast %cst_9 : f32 to vector<16x1xf32>
    %24 = arith.divf %22, %23 : vector<16x1xf32>
    %25 = vector.broadcast %24 : vector<16x1xf32> to vector<16x32xf32>
    %26 = arith.subf %6, %25 : vector<16x32xf32>
    %27 = arith.mulf %26, %26 : vector<16x32xf32>
    %cst_10 = arith.constant dense<0.000000e+00> : vector<16xf32>
    %28 = vector.multi_reduction <add>, %27, %cst_10 [1] : vector<16x32xf32> to vector<16xf32>
    %29 = vector.shape_cast %28 : vector<16xf32> to vector<16x1xf32>
    %cst_11 = arith.constant 3.200000e+01 : f32
    %30 = vector.broadcast %cst_11 : f32 to vector<16x1xf32>
    %31 = arith.divf %29, %30 : vector<16x1xf32>
    %32 = vector.broadcast %24 : vector<16x1xf32> to vector<16x32xf32>
    %33 = arith.subf %6, %32 : vector<16x32xf32>
    %cst_12 = arith.constant 9.99999974E-6 : f32
    %34 = vector.broadcast %cst_12 : f32 to vector<16x1xf32>
    %35 = arith.addf %31, %34 : vector<16x1xf32>
    %36 = math.rsqrt %35 : vector<16x1xf32>
    %37 = vector.broadcast %36 : vector<16x1xf32> to vector<16x32xf32>
    %38 = arith.mulf %33, %37 : vector<16x32xf32>
    %39 = vector.broadcast %19 : vector<1x32xf32> to vector<16x32xf32>
    %40 = arith.mulf %38, %39 : vector<16x32xf32>
    %41 = vector.broadcast %20 : vector<1x32xf32> to vector<16x32xf32>
    %42 = arith.addf %40, %41 : vector<16x32xf32>
    %43 = arith.truncf %42 : vector<16x32xf32> to vector<16x32xbf16>
    %c192 = arith.constant 192 : index
    %c0_13 = arith.constant 0 : index
    %44 = vector.load %arg1[%c192, %c0_13] : memref<864x128xbf16, #tpu.memory_space<vmem>>, vector<32x16xbf16>
    %c224 = arith.constant 224 : index
    %c0_14 = arith.constant 0 : index
    %45 = vector.load %arg1[%c224, %c0_14] : memref<864x128xbf16, #tpu.memory_space<vmem>>, vector<32x16xbf16>
    %c256 = arith.constant 256 : index
    %c0_15 = arith.constant 0 : index
    %46 = vector.load %arg1[%c256, %c0_15] : memref<864x128xbf16, #tpu.memory_space<vmem>>, vector<32x16xbf16>
    %c18 = arith.constant 18 : index
    %c0_16 = arith.constant 0 : index
    %47 = vector.load %arg2[%c18, %c0_16] : memref<48x128xf32, #tpu.memory_space<vmem>>, vector<1x16xf32>
    %c20 = arith.constant 20 : index
    %c0_17 = arith.constant 0 : index
    %48 = vector.load %arg2[%c20, %c0_17] : memref<48x128xf32, #tpu.memory_space<vmem>>, vector<1x16xf32>
    %c22 = arith.constant 22 : index
    %c0_18 = arith.constant 0 : index
    %49 = vector.load %arg2[%c22, %c0_18] : memref<48x128xf32, #tpu.memory_space<vmem>>, vector<1x16xf32>
    %cst_19 = arith.constant dense<0.000000e+00> : vector<16x16xf32>
    %50 = tpu.matmul %43, %44, %cst_19 {dimension_numbers = #tpu.dot_dimension_numbers<[1], [0], [0], [1], [0, 0, 1, 1], [], []>} : vector<16x32xbf16>, vector<32x16xbf16>, vector<16x16xf32> -> vector<16x16xf32>
    %51 = vector.broadcast %47 : vector<1x16xf32> to vector<16x16xf32>
    %52 = arith.addf %50, %51 : vector<16x16xf32>
    %cst_20 = arith.constant dense<0.000000e+00> : vector<16x16xf32>
    %53 = tpu.matmul %43, %45, %cst_20 {dimension_numbers = #tpu.dot_dimension_numbers<[1], [0], [0], [1], [0, 0, 1, 1], [], []>} : vector<16x32xbf16>, vector<32x16xbf16>, vector<16x16xf32> -> vector<16x16xf32>
    %54 = vector.broadcast %48 : vector<1x16xf32> to vector<16x16xf32>
    %55 = arith.addf %53, %54 : vector<16x16xf32>
    %cst_21 = arith.constant dense<0.000000e+00> : vector<16x16xf32>
    %56 = tpu.matmul %43, %46, %cst_21 {dimension_numbers = #tpu.dot_dimension_numbers<[1], [0], [0], [1], [0, 0, 1, 1], [], []>} : vector<16x32xbf16>, vector<32x16xbf16>, vector<16x16xf32> -> vector<16x16xf32>
    %57 = vector.broadcast %49 : vector<1x16xf32> to vector<16x16xf32>
    %58 = arith.addf %56, %57 : vector<16x16xf32>
    %59 = arith.truncf %52 : vector<16x16xf32> to vector<16x16xbf16>
    %60 = arith.truncf %55 : vector<16x16xf32> to vector<16x16xbf16>
    %cst_22 = arith.constant dense<0.000000e+00> : vector<16x16xf32>
    %61 = tpu.matmul %59, %60, %cst_22 {dimension_numbers = #tpu.dot_dimension_numbers<[1], [1], [0], [0], [0, 0, 1, 0], [], []>} : vector<16x16xbf16>, vector<16x16xbf16>, vector<16x16xf32> -> vector<16x16xf32>
    %cst_23 = arith.constant 2.500000e-01 : f32
    %62 = vector.broadcast %cst_23 : f32 to vector<16x16xf32>
    %63 = arith.mulf %61, %62 : vector<16x16xf32>
    %cst_24 = arith.constant -1.000000e+30 : f32
    %64 = vector.broadcast %cst_24 : f32 to vector<16x16xf32>
    %65 = arith.select %18, %63, %64 : vector<16x16xi1>, vector<16x16xf32>
    %cst_25 = arith.constant dense<0xFF800000> : vector<16xf32>
    %66 = vector.multi_reduction <maximumf>, %65, %cst_25 [1] : vector<16x16xf32> to vector<16xf32>
    %67 = vector.shape_cast %66 : vector<16xf32> to vector<16x1xf32>
    %68 = vector.broadcast %67 : vector<16x1xf32> to vector<16x16xf32>
    %69 = arith.subf %65, %68 : vector<16x16xf32>
    %70 = math.exp %69 : vector<16x16xf32>
    %cst_26 = arith.constant dense<0.000000e+00> : vector<16xf32>
    %71 = vector.multi_reduction <add>, %70, %cst_26 [1] : vector<16x16xf32> to vector<16xf32>
    %72 = vector.shape_cast %71 : vector<16xf32> to vector<16x1xf32>
    %73 = tpu.reciprocal %72 {approx = true} : vector<16x1xf32> -> vector<16x1xf32>
    %74 = vector.broadcast %73 : vector<16x1xf32> to vector<16x16xf32>
    %75 = arith.mulf %70, %74 : vector<16x16xf32>
    %76 = arith.truncf %75 : vector<16x16xf32> to vector<16x16xbf16>
    %77 = arith.truncf %58 : vector<16x16xf32> to vector<16x16xbf16>
    %cst_27 = arith.constant dense<0.000000e+00> : vector<16x16xf32>
    %78 = tpu.matmul %76, %77, %cst_27 {dimension_numbers = #tpu.dot_dimension_numbers<[1], [0], [0], [1], [0, 0, 1, 1], [], []>} : vector<16x16xbf16>, vector<16x16xbf16>, vector<16x16xf32> -> vector<16x16xf32>
    %c288 = arith.constant 288 : index
    %c0_28 = arith.constant 0 : index
    %79 = vector.load %arg1[%c288, %c0_28] : memref<864x128xbf16, #tpu.memory_space<vmem>>, vector<32x16xbf16>
    %c320 = arith.constant 320 : index
    %c0_29 = arith.constant 0 : index
    %80 = vector.load %arg1[%c320, %c0_29] : memref<864x128xbf16, #tpu.memory_space<vmem>>, vector<32x16xbf16>
    %c352 = arith.constant 352 : index
    %c0_30 = arith.constant 0 : index
    %81 = vector.load %arg1[%c352, %c0_30] : memref<864x128xbf16, #tpu.memory_space<vmem>>, vector<32x16xbf16>
    %c19 = arith.constant 19 : index
    %c0_31 = arith.constant 0 : index
    %82 = vector.load %arg2[%c19, %c0_31] : memref<48x128xf32, #tpu.memory_space<vmem>>, vector<1x16xf32>
    %c21 = arith.constant 21 : index
    %c0_32 = arith.constant 0 : index
    %83 = vector.load %arg2[%c21, %c0_32] : memref<48x128xf32, #tpu.memory_space<vmem>>, vector<1x16xf32>
    %c23 = arith.constant 23 : index
    %c0_33 = arith.constant 0 : index
    %84 = vector.load %arg2[%c23, %c0_33] : memref<48x128xf32, #tpu.memory_space<vmem>>, vector<1x16xf32>
    %cst_34 = arith.constant dense<0.000000e+00> : vector<16x16xf32>
    %85 = tpu.matmul %43, %79, %cst_34 {dimension_numbers = #tpu.dot_dimension_numbers<[1], [0], [0], [1], [0, 0, 1, 1], [], []>} : vector<16x32xbf16>, vector<32x16xbf16>, vector<16x16xf32> -> vector<16x16xf32>
    %86 = vector.broadcast %82 : vector<1x16xf32> to vector<16x16xf32>
    %87 = arith.addf %85, %86 : vector<16x16xf32>
    %cst_35 = arith.constant dense<0.000000e+00> : vector<16x16xf32>
    %88 = tpu.matmul %43, %80, %cst_35 {dimension_numbers = #tpu.dot_dimension_numbers<[1], [0], [0], [1], [0, 0, 1, 1], [], []>} : vector<16x32xbf16>, vector<32x16xbf16>, vector<16x16xf32> -> vector<16x16xf32>
    %89 = vector.broadcast %83 : vector<1x16xf32> to vector<16x16xf32>
    %90 = arith.addf %88, %89 : vector<16x16xf32>
    %cst_36 = arith.constant dense<0.000000e+00> : vector<16x16xf32>
    %91 = tpu.matmul %43, %81, %cst_36 {dimension_numbers = #tpu.dot_dimension_numbers<[1], [0], [0], [1], [0, 0, 1, 1], [], []>} : vector<16x32xbf16>, vector<32x16xbf16>, vector<16x16xf32> -> vector<16x16xf32>
    %92 = vector.broadcast %84 : vector<1x16xf32> to vector<16x16xf32>
    %93 = arith.addf %91, %92 : vector<16x16xf32>
    %94 = arith.truncf %87 : vector<16x16xf32> to vector<16x16xbf16>
    %95 = arith.truncf %90 : vector<16x16xf32> to vector<16x16xbf16>
    %cst_37 = arith.constant dense<0.000000e+00> : vector<16x16xf32>
    %96 = tpu.matmul %94, %95, %cst_37 {dimension_numbers = #tpu.dot_dimension_numbers<[1], [1], [0], [0], [0, 0, 1, 0], [], []>} : vector<16x16xbf16>, vector<16x16xbf16>, vector<16x16xf32> -> vector<16x16xf32>
    %cst_38 = arith.constant 2.500000e-01 : f32
    %97 = vector.broadcast %cst_38 : f32 to vector<16x16xf32>
    %98 = arith.mulf %96, %97 : vector<16x16xf32>
    %cst_39 = arith.constant -1.000000e+30 : f32
    %99 = vector.broadcast %cst_39 : f32 to vector<16x16xf32>
    %100 = arith.select %18, %98, %99 : vector<16x16xi1>, vector<16x16xf32>
    %cst_40 = arith.constant dense<0xFF800000> : vector<16xf32>
    %101 = vector.multi_reduction <maximumf>, %100, %cst_40 [1] : vector<16x16xf32> to vector<16xf32>
    %102 = vector.shape_cast %101 : vector<16xf32> to vector<16x1xf32>
    %103 = vector.broadcast %102 : vector<16x1xf32> to vector<16x16xf32>
    %104 = arith.subf %100, %103 : vector<16x16xf32>
    %105 = math.exp %104 : vector<16x16xf32>
    %cst_41 = arith.constant dense<0.000000e+00> : vector<16xf32>
    %106 = vector.multi_reduction <add>, %105, %cst_41 [1] : vector<16x16xf32> to vector<16xf32>
    %107 = vector.shape_cast %106 : vector<16xf32> to vector<16x1xf32>
    %108 = tpu.reciprocal %107 {approx = true} : vector<16x1xf32> -> vector<16x1xf32>
    %109 = vector.broadcast %108 : vector<16x1xf32> to vector<16x16xf32>
    %110 = arith.mulf %105, %109 : vector<16x16xf32>
    %111 = arith.truncf %110 : vector<16x16xf32> to vector<16x16xbf16>
    %112 = arith.truncf %93 : vector<16x16xf32> to vector<16x16xbf16>
    %cst_42 = arith.constant dense<0.000000e+00> : vector<16x16xf32>
    %113 = tpu.matmul %111, %112, %cst_42 {dimension_numbers = #tpu.dot_dimension_numbers<[1], [0], [0], [1], [0, 0, 1, 1], [], []>} : vector<16x16xbf16>, vector<16x16xbf16>, vector<16x16xf32> -> vector<16x16xf32>
    %114 = tpu.concatenate %78, %113 in 1 : vector<16x16xf32>, vector<16x16xf32> -> vector<16x32xf32>
    %c384 = arith.constant 384 : index
    %c0_43 = arith.constant 0 : index
    %115 = vector.load %arg1[%c384, %c0_43] : memref<864x128xbf16, #tpu.memory_space<vmem>>, vector<32x32xbf16>
    %c24 = arith.constant 24 : index
    %c0_44 = arith.constant 0 : index
    %116 = vector.load %arg2[%c24, %c0_44] : memref<48x128xf32, #tpu.memory_space<vmem>>, vector<1x32xf32>
    %117 = arith.truncf %114 : vector<16x32xf32> to vector<16x32xbf16>
    %cst_45 = arith.constant dense<0.000000e+00> : vector<16x32xf32>
    %118 = tpu.matmul %117, %115, %cst_45 {dimension_numbers = #tpu.dot_dimension_numbers<[1], [0], [0], [1], [0, 0, 1, 1], [], []>} : vector<16x32xbf16>, vector<32x32xbf16>, vector<16x32xf32> -> vector<16x32xf32>
    %119 = arith.addf %6, %118 : vector<16x32xf32>
    %120 = vector.broadcast %116 : vector<1x32xf32> to vector<16x32xf32>
    %121 = arith.addf %119, %120 : vector<16x32xf32>
    %c25 = arith.constant 25 : index
    %c0_46 = arith.constant 0 : index
    %122 = vector.load %arg2[%c25, %c0_46] : memref<48x128xf32, #tpu.memory_space<vmem>>, vector<1x32xf32>
    %c26 = arith.constant 26 : index
    %c0_47 = arith.constant 0 : index
    %123 = vector.load %arg2[%c26, %c0_47] : memref<48x128xf32, #tpu.memory_space<vmem>>, vector<1x32xf32>
    %cst_48 = arith.constant dense<0.000000e+00> : vector<16xf32>
    %124 = vector.multi_reduction <add>, %121, %cst_48 [1] : vector<16x32xf32> to vector<16xf32>
    %125 = vector.shape_cast %124 : vector<16xf32> to vector<16x1xf32>
    %cst_49 = arith.constant 3.200000e+01 : f32
    %126 = vector.broadcast %cst_49 : f32 to vector<16x1xf32>
    %127 = arith.divf %125, %126 : vector<16x1xf32>
    %128 = vector.broadcast %127 : vector<16x1xf32> to vector<16x32xf32>
    %129 = arith.subf %121, %128 : vector<16x32xf32>
    %130 = arith.mulf %129, %129 : vector<16x32xf32>
    %cst_50 = arith.constant dense<0.000000e+00> : vector<16xf32>
    %131 = vector.multi_reduction <add>, %130, %cst_50 [1] : vector<16x32xf32> to vector<16xf32>
    %132 = vector.shape_cast %131 : vector<16xf32> to vector<16x1xf32>
    %cst_51 = arith.constant 3.200000e+01 : f32
    %133 = vector.broadcast %cst_51 : f32 to vector<16x1xf32>
    %134 = arith.divf %132, %133 : vector<16x1xf32>
    %135 = vector.broadcast %127 : vector<16x1xf32> to vector<16x32xf32>
    %136 = arith.subf %121, %135 : vector<16x32xf32>
    %cst_52 = arith.constant 9.99999974E-6 : f32
    %137 = vector.broadcast %cst_52 : f32 to vector<16x1xf32>
    %138 = arith.addf %134, %137 : vector<16x1xf32>
    %139 = math.rsqrt %138 : vector<16x1xf32>
    %140 = vector.broadcast %139 : vector<16x1xf32> to vector<16x32xf32>
    %141 = arith.mulf %136, %140 : vector<16x32xf32>
    %142 = vector.broadcast %122 : vector<1x32xf32> to vector<16x32xf32>
    %143 = arith.mulf %141, %142 : vector<16x32xf32>
    %144 = vector.broadcast %123 : vector<1x32xf32> to vector<16x32xf32>
    %145 = arith.addf %143, %144 : vector<16x32xf32>
    %c416 = arith.constant 416 : index
    %c0_53 = arith.constant 0 : index
    %146 = vector.load %arg1[%c416, %c0_53] : memref<864x128xbf16, #tpu.memory_space<vmem>>, vector<32x64xbf16>
    %c27 = arith.constant 27 : index
    %c0_54 = arith.constant 0 : index
    %147 = vector.load %arg2[%c27, %c0_54] : memref<48x128xf32, #tpu.memory_space<vmem>>, vector<1x64xf32>
    %148 = arith.truncf %145 : vector<16x32xf32> to vector<16x32xbf16>
    %cst_55 = arith.constant dense<0.000000e+00> : vector<16x64xf32>
    %149 = tpu.matmul %148, %146, %cst_55 {dimension_numbers = #tpu.dot_dimension_numbers<[1], [0], [0], [1], [0, 0, 1, 1], [], []>} : vector<16x32xbf16>, vector<32x64xbf16>, vector<16x64xf32> -> vector<16x64xf32>
    %150 = vector.broadcast %147 : vector<1x64xf32> to vector<16x64xf32>
    %151 = arith.addf %149, %150 : vector<16x64xf32>
    %152 = arith.mulf %151, %151 : vector<16x64xf32>
    %153 = arith.mulf %151, %152 : vector<16x64xf32>
    %cst_56 = arith.constant 4.471500e-02 : f32
    %154 = vector.broadcast %cst_56 : f32 to vector<16x64xf32>
    %155 = arith.mulf %154, %153 : vector<16x64xf32>
    %156 = arith.addf %151, %155 : vector<16x64xf32>
    %cst_57 = arith.constant 0.797884583 : f32
    %157 = vector.broadcast %cst_57 : f32 to vector<16x64xf32>
    %158 = arith.mulf %157, %156 : vector<16x64xf32>
    %159 = math.tanh %158 : vector<16x64xf32>
    %cst_58 = arith.constant 1.000000e+00 : f32
    %160 = vector.broadcast %cst_58 : f32 to vector<16x64xf32>
    %161 = arith.addf %160, %159 : vector<16x64xf32>
    %cst_59 = arith.constant 5.000000e-01 : f32
    %162 = vector.broadcast %cst_59 : f32 to vector<16x64xf32>
    %163 = arith.mulf %162, %161 : vector<16x64xf32>
    %164 = arith.mulf %151, %163 : vector<16x64xf32>
    %c448 = arith.constant 448 : index
    %c0_60 = arith.constant 0 : index
    %165 = vector.load %arg1[%c448, %c0_60] : memref<864x128xbf16, #tpu.memory_space<vmem>>, vector<64x32xbf16>
    %c28 = arith.constant 28 : index
    %c0_61 = arith.constant 0 : index
    %166 = vector.load %arg2[%c28, %c0_61] : memref<48x128xf32, #tpu.memory_space<vmem>>, vector<1x32xf32>
    %167 = arith.truncf %164 : vector<16x64xf32> to vector<16x64xbf16>
    %cst_62 = arith.constant dense<0.000000e+00> : vector<16x32xf32>
    %168 = tpu.matmul %167, %165, %cst_62 {dimension_numbers = #tpu.dot_dimension_numbers<[1], [0], [0], [1], [0, 0, 1, 1], [], []>} : vector<16x64xbf16>, vector<64x32xbf16>, vector<16x32xf32> -> vector<16x32xf32>
    %169 = arith.addf %121, %168 : vector<16x32xf32>
    %170 = vector.broadcast %166 : vector<1x32xf32> to vector<16x32xf32>
    %171 = arith.addf %169, %170 : vector<16x32xf32>
    %c32 = arith.constant 32 : index
    %c0_63 = arith.constant 0 : index
    %172 = vector.load %arg2[%c32, %c0_63] : memref<48x128xf32, #tpu.memory_space<vmem>>, vector<1x32xf32>
    %c33 = arith.constant 33 : index
    %c0_64 = arith.constant 0 : index
    %173 = vector.load %arg2[%c33, %c0_64] : memref<48x128xf32, #tpu.memory_space<vmem>>, vector<1x32xf32>
    %cst_65 = arith.constant dense<0.000000e+00> : vector<16xf32>
    %174 = vector.multi_reduction <add>, %171, %cst_65 [1] : vector<16x32xf32> to vector<16xf32>
    %175 = vector.shape_cast %174 : vector<16xf32> to vector<16x1xf32>
    %cst_66 = arith.constant 3.200000e+01 : f32
    %176 = vector.broadcast %cst_66 : f32 to vector<16x1xf32>
    %177 = arith.divf %175, %176 : vector<16x1xf32>
    %178 = vector.broadcast %177 : vector<16x1xf32> to vector<16x32xf32>
    %179 = arith.subf %171, %178 : vector<16x32xf32>
    %180 = arith.mulf %179, %179 : vector<16x32xf32>
    %cst_67 = arith.constant dense<0.000000e+00> : vector<16xf32>
    %181 = vector.multi_reduction <add>, %180, %cst_67 [1] : vector<16x32xf32> to vector<16xf32>
    %182 = vector.shape_cast %181 : vector<16xf32> to vector<16x1xf32>
    %cst_68 = arith.constant 3.200000e+01 : f32
    %183 = vector.broadcast %cst_68 : f32 to vector<16x1xf32>
    %184 = arith.divf %182, %183 : vector<16x1xf32>
    %185 = vector.broadcast %177 : vector<16x1xf32> to vector<16x32xf32>
    %186 = arith.subf %171, %185 : vector<16x32xf32>
    %cst_69 = arith.constant 9.99999974E-6 : f32
    %187 = vector.broadcast %cst_69 : f32 to vector<16x1xf32>
    %188 = arith.addf %184, %187 : vector<16x1xf32>
    %189 = math.rsqrt %188 : vector<16x1xf32>
    %190 = vector.broadcast %189 : vector<16x1xf32> to vector<16x32xf32>
    %191 = arith.mulf %186, %190 : vector<16x32xf32>
    %192 = vector.broadcast %172 : vector<1x32xf32> to vector<16x32xf32>
    %193 = arith.mulf %191, %192 : vector<16x32xf32>
    %194 = vector.broadcast %173 : vector<1x32xf32> to vector<16x32xf32>
    %195 = arith.addf %193, %194 : vector<16x32xf32>
    %196 = arith.truncf %195 : vector<16x32xf32> to vector<16x32xbf16>
    %c512 = arith.constant 512 : index
    %c0_70 = arith.constant 0 : index
    %197 = vector.load %arg1[%c512, %c0_70] : memref<864x128xbf16, #tpu.memory_space<vmem>>, vector<32x16xbf16>
    %c544 = arith.constant 544 : index
    %c0_71 = arith.constant 0 : index
    %198 = vector.load %arg1[%c544, %c0_71] : memref<864x128xbf16, #tpu.memory_space<vmem>>, vector<32x16xbf16>
    %c576 = arith.constant 576 : index
    %c0_72 = arith.constant 0 : index
    %199 = vector.load %arg1[%c576, %c0_72] : memref<864x128xbf16, #tpu.memory_space<vmem>>, vector<32x16xbf16>
    %c34 = arith.constant 34 : index
    %c0_73 = arith.constant 0 : index
    %200 = vector.load %arg2[%c34, %c0_73] : memref<48x128xf32, #tpu.memory_space<vmem>>, vector<1x16xf32>
    %c36 = arith.constant 36 : index
    %c0_74 = arith.constant 0 : index
    %201 = vector.load %arg2[%c36, %c0_74] : memref<48x128xf32, #tpu.memory_space<vmem>>, vector<1x16xf32>
    %c38 = arith.constant 38 : index
    %c0_75 = arith.constant 0 : index
    %202 = vector.load %arg2[%c38, %c0_75] : memref<48x128xf32, #tpu.memory_space<vmem>>, vector<1x16xf32>
    %cst_76 = arith.constant dense<0.000000e+00> : vector<16x16xf32>
    %203 = tpu.matmul %196, %197, %cst_76 {dimension_numbers = #tpu.dot_dimension_numbers<[1], [0], [0], [1], [0, 0, 1, 1], [], []>} : vector<16x32xbf16>, vector<32x16xbf16>, vector<16x16xf32> -> vector<16x16xf32>
    %204 = vector.broadcast %200 : vector<1x16xf32> to vector<16x16xf32>
    %205 = arith.addf %203, %204 : vector<16x16xf32>
    %cst_77 = arith.constant dense<0.000000e+00> : vector<16x16xf32>
    %206 = tpu.matmul %196, %198, %cst_77 {dimension_numbers = #tpu.dot_dimension_numbers<[1], [0], [0], [1], [0, 0, 1, 1], [], []>} : vector<16x32xbf16>, vector<32x16xbf16>, vector<16x16xf32> -> vector<16x16xf32>
    %207 = vector.broadcast %201 : vector<1x16xf32> to vector<16x16xf32>
    %208 = arith.addf %206, %207 : vector<16x16xf32>
    %cst_78 = arith.constant dense<0.000000e+00> : vector<16x16xf32>
    %209 = tpu.matmul %196, %199, %cst_78 {dimension_numbers = #tpu.dot_dimension_numbers<[1], [0], [0], [1], [0, 0, 1, 1], [], []>} : vector<16x32xbf16>, vector<32x16xbf16>, vector<16x16xf32> -> vector<16x16xf32>
    %210 = vector.broadcast %202 : vector<1x16xf32> to vector<16x16xf32>
    %211 = arith.addf %209, %210 : vector<16x16xf32>
    %212 = arith.truncf %205 : vector<16x16xf32> to vector<16x16xbf16>
    %213 = arith.truncf %208 : vector<16x16xf32> to vector<16x16xbf16>
    %cst_79 = arith.constant dense<0.000000e+00> : vector<16x16xf32>
    %214 = tpu.matmul %212, %213, %cst_79 {dimension_numbers = #tpu.dot_dimension_numbers<[1], [1], [0], [0], [0, 0, 1, 0], [], []>} : vector<16x16xbf16>, vector<16x16xbf16>, vector<16x16xf32> -> vector<16x16xf32>
    %cst_80 = arith.constant 2.500000e-01 : f32
    %215 = vector.broadcast %cst_80 : f32 to vector<16x16xf32>
    %216 = arith.mulf %214, %215 : vector<16x16xf32>
    %cst_81 = arith.constant -1.000000e+30 : f32
    %217 = vector.broadcast %cst_81 : f32 to vector<16x16xf32>
    %218 = arith.select %18, %216, %217 : vector<16x16xi1>, vector<16x16xf32>
    %cst_82 = arith.constant dense<0xFF800000> : vector<16xf32>
    %219 = vector.multi_reduction <maximumf>, %218, %cst_82 [1] : vector<16x16xf32> to vector<16xf32>
    %220 = vector.shape_cast %219 : vector<16xf32> to vector<16x1xf32>
    %221 = vector.broadcast %220 : vector<16x1xf32> to vector<16x16xf32>
    %222 = arith.subf %218, %221 : vector<16x16xf32>
    %223 = math.exp %222 : vector<16x16xf32>
    %cst_83 = arith.constant dense<0.000000e+00> : vector<16xf32>
    %224 = vector.multi_reduction <add>, %223, %cst_83 [1] : vector<16x16xf32> to vector<16xf32>
    %225 = vector.shape_cast %224 : vector<16xf32> to vector<16x1xf32>
    %226 = tpu.reciprocal %225 {approx = true} : vector<16x1xf32> -> vector<16x1xf32>
    %227 = vector.broadcast %226 : vector<16x1xf32> to vector<16x16xf32>
    %228 = arith.mulf %223, %227 : vector<16x16xf32>
    %229 = arith.truncf %228 : vector<16x16xf32> to vector<16x16xbf16>
    %230 = arith.truncf %211 : vector<16x16xf32> to vector<16x16xbf16>
    %cst_84 = arith.constant dense<0.000000e+00> : vector<16x16xf32>
    %231 = tpu.matmul %229, %230, %cst_84 {dimension_numbers = #tpu.dot_dimension_numbers<[1], [0], [0], [1], [0, 0, 1, 1], [], []>} : vector<16x16xbf16>, vector<16x16xbf16>, vector<16x16xf32> -> vector<16x16xf32>
    %c608 = arith.constant 608 : index
    %c0_85 = arith.constant 0 : index
    %232 = vector.load %arg1[%c608, %c0_85] : memref<864x128xbf16, #tpu.memory_space<vmem>>, vector<32x16xbf16>
    %c640 = arith.constant 640 : index
    %c0_86 = arith.constant 0 : index
    %233 = vector.load %arg1[%c640, %c0_86] : memref<864x128xbf16, #tpu.memory_space<vmem>>, vector<32x16xbf16>
    %c672 = arith.constant 672 : index
    %c0_87 = arith.constant 0 : index
    %234 = vector.load %arg1[%c672, %c0_87] : memref<864x128xbf16, #tpu.memory_space<vmem>>, vector<32x16xbf16>
    %c35 = arith.constant 35 : index
    %c0_88 = arith.constant 0 : index
    %235 = vector.load %arg2[%c35, %c0_88] : memref<48x128xf32, #tpu.memory_space<vmem>>, vector<1x16xf32>
    %c37 = arith.constant 37 : index
    %c0_89 = arith.constant 0 : index
    %236 = vector.load %arg2[%c37, %c0_89] : memref<48x128xf32, #tpu.memory_space<vmem>>, vector<1x16xf32>
    %c39 = arith.constant 39 : index
    %c0_90 = arith.constant 0 : index
    %237 = vector.load %arg2[%c39, %c0_90] : memref<48x128xf32, #tpu.memory_space<vmem>>, vector<1x16xf32>
    %cst_91 = arith.constant dense<0.000000e+00> : vector<16x16xf32>
    %238 = tpu.matmul %196, %232, %cst_91 {dimension_numbers = #tpu.dot_dimension_numbers<[1], [0], [0], [1], [0, 0, 1, 1], [], []>} : vector<16x32xbf16>, vector<32x16xbf16>, vector<16x16xf32> -> vector<16x16xf32>
    %239 = vector.broadcast %235 : vector<1x16xf32> to vector<16x16xf32>
    %240 = arith.addf %238, %239 : vector<16x16xf32>
    %cst_92 = arith.constant dense<0.000000e+00> : vector<16x16xf32>
    %241 = tpu.matmul %196, %233, %cst_92 {dimension_numbers = #tpu.dot_dimension_numbers<[1], [0], [0], [1], [0, 0, 1, 1], [], []>} : vector<16x32xbf16>, vector<32x16xbf16>, vector<16x16xf32> -> vector<16x16xf32>
    %242 = vector.broadcast %236 : vector<1x16xf32> to vector<16x16xf32>
    %243 = arith.addf %241, %242 : vector<16x16xf32>
    %cst_93 = arith.constant dense<0.000000e+00> : vector<16x16xf32>
    %244 = tpu.matmul %196, %234, %cst_93 {dimension_numbers = #tpu.dot_dimension_numbers<[1], [0], [0], [1], [0, 0, 1, 1], [], []>} : vector<16x32xbf16>, vector<32x16xbf16>, vector<16x16xf32> -> vector<16x16xf32>
    %245 = vector.broadcast %237 : vector<1x16xf32> to vector<16x16xf32>
    %246 = arith.addf %244, %245 : vector<16x16xf32>
    %247 = arith.truncf %240 : vector<16x16xf32> to vector<16x16xbf16>
    %248 = arith.truncf %243 : vector<16x16xf32> to vector<16x16xbf16>
    %cst_94 = arith.constant dense<0.000000e+00> : vector<16x16xf32>
    %249 = tpu.matmul %247, %248, %cst_94 {dimension_numbers = #tpu.dot_dimension_numbers<[1], [1], [0], [0], [0, 0, 1, 0], [], []>} : vector<16x16xbf16>, vector<16x16xbf16>, vector<16x16xf32> -> vector<16x16xf32>
    %cst_95 = arith.constant 2.500000e-01 : f32
    %250 = vector.broadcast %cst_95 : f32 to vector<16x16xf32>
    %251 = arith.mulf %249, %250 : vector<16x16xf32>
    %cst_96 = arith.constant -1.000000e+30 : f32
    %252 = vector.broadcast %cst_96 : f32 to vector<16x16xf32>
    %253 = arith.select %18, %251, %252 : vector<16x16xi1>, vector<16x16xf32>
    %cst_97 = arith.constant dense<0xFF800000> : vector<16xf32>
    %254 = vector.multi_reduction <maximumf>, %253, %cst_97 [1] : vector<16x16xf32> to vector<16xf32>
    %255 = vector.shape_cast %254 : vector<16xf32> to vector<16x1xf32>
    %256 = vector.broadcast %255 : vector<16x1xf32> to vector<16x16xf32>
    %257 = arith.subf %253, %256 : vector<16x16xf32>
    %258 = math.exp %257 : vector<16x16xf32>
    %cst_98 = arith.constant dense<0.000000e+00> : vector<16xf32>
    %259 = vector.multi_reduction <add>, %258, %cst_98 [1] : vector<16x16xf32> to vector<16xf32>
    %260 = vector.shape_cast %259 : vector<16xf32> to vector<16x1xf32>
    %261 = tpu.reciprocal %260 {approx = true} : vector<16x1xf32> -> vector<16x1xf32>
    %262 = vector.broadcast %261 : vector<16x1xf32> to vector<16x16xf32>
    %263 = arith.mulf %258, %262 : vector<16x16xf32>
    %264 = arith.truncf %263 : vector<16x16xf32> to vector<16x16xbf16>
    %265 = arith.truncf %246 : vector<16x16xf32> to vector<16x16xbf16>
    %cst_99 = arith.constant dense<0.000000e+00> : vector<16x16xf32>
    %266 = tpu.matmul %264, %265, %cst_99 {dimension_numbers = #tpu.dot_dimension_numbers<[1], [0], [0], [1], [0, 0, 1, 1], [], []>} : vector<16x16xbf16>, vector<16x16xbf16>, vector<16x16xf32> -> vector<16x16xf32>
    %267 = tpu.concatenate %231, %266 in 1 : vector<16x16xf32>, vector<16x16xf32> -> vector<16x32xf32>
    %c704 = arith.constant 704 : index
    %c0_100 = arith.constant 0 : index
    %268 = vector.load %arg1[%c704, %c0_100] : memref<864x128xbf16, #tpu.memory_space<vmem>>, vector<32x32xbf16>
    %c40 = arith.constant 40 : index
    %c0_101 = arith.constant 0 : index
    %269 = vector.load %arg2[%c40, %c0_101] : memref<48x128xf32, #tpu.memory_space<vmem>>, vector<1x32xf32>
    %270 = arith.truncf %267 : vector<16x32xf32> to vector<16x32xbf16>
    %cst_102 = arith.constant dense<0.000000e+00> : vector<16x32xf32>
    %271 = tpu.matmul %270, %268, %cst_102 {dimension_numbers = #tpu.dot_dimension_numbers<[1], [0], [0], [1], [0, 0, 1, 1], [], []>} : vector<16x32xbf16>, vector<32x32xbf16>, vector<16x32xf32> -> vector<16x32xf32>
    %272 = arith.addf %171, %271 : vector<16x32xf32>
    %273 = vector.broadcast %269 : vector<1x32xf32> to vector<16x32xf32>
    %274 = arith.addf %272, %273 : vector<16x32xf32>
    %c41 = arith.constant 41 : index
    %c0_103 = arith.constant 0 : index
    %275 = vector.load %arg2[%c41, %c0_103] : memref<48x128xf32, #tpu.memory_space<vmem>>, vector<1x32xf32>
    %c42 = arith.constant 42 : index
    %c0_104 = arith.constant 0 : index
    %276 = vector.load %arg2[%c42, %c0_104] : memref<48x128xf32, #tpu.memory_space<vmem>>, vector<1x32xf32>
    %cst_105 = arith.constant dense<0.000000e+00> : vector<16xf32>
    %277 = vector.multi_reduction <add>, %274, %cst_105 [1] : vector<16x32xf32> to vector<16xf32>
    %278 = vector.shape_cast %277 : vector<16xf32> to vector<16x1xf32>
    %cst_106 = arith.constant 3.200000e+01 : f32
    %279 = vector.broadcast %cst_106 : f32 to vector<16x1xf32>
    %280 = arith.divf %278, %279 : vector<16x1xf32>
    %281 = vector.broadcast %280 : vector<16x1xf32> to vector<16x32xf32>
    %282 = arith.subf %274, %281 : vector<16x32xf32>
    %283 = arith.mulf %282, %282 : vector<16x32xf32>
    %cst_107 = arith.constant dense<0.000000e+00> : vector<16xf32>
    %284 = vector.multi_reduction <add>, %283, %cst_107 [1] : vector<16x32xf32> to vector<16xf32>
    %285 = vector.shape_cast %284 : vector<16xf32> to vector<16x1xf32>
    %cst_108 = arith.constant 3.200000e+01 : f32
    %286 = vector.broadcast %cst_108 : f32 to vector<16x1xf32>
    %287 = arith.divf %285, %286 : vector<16x1xf32>
    %288 = vector.broadcast %280 : vector<16x1xf32> to vector<16x32xf32>
    %289 = arith.subf %274, %288 : vector<16x32xf32>
    %cst_109 = arith.constant 9.99999974E-6 : f32
    %290 = vector.broadcast %cst_109 : f32 to vector<16x1xf32>
    %291 = arith.addf %287, %290 : vector<16x1xf32>
    %292 = math.rsqrt %291 : vector<16x1xf32>
    %293 = vector.broadcast %292 : vector<16x1xf32> to vector<16x32xf32>
    %294 = arith.mulf %289, %293 : vector<16x32xf32>
    %295 = vector.broadcast %275 : vector<1x32xf32> to vector<16x32xf32>
    %296 = arith.mulf %294, %295 : vector<16x32xf32>
    %297 = vector.broadcast %276 : vector<1x32xf32> to vector<16x32xf32>
    %298 = arith.addf %296, %297 : vector<16x32xf32>
    %c736 = arith.constant 736 : index
    %c0_110 = arith.constant 0 : index
    %299 = vector.load %arg1[%c736, %c0_110] : memref<864x128xbf16, #tpu.memory_space<vmem>>, vector<32x64xbf16>
    %c43 = arith.constant 43 : index
    %c0_111 = arith.constant 0 : index
    %300 = vector.load %arg2[%c43, %c0_111] : memref<48x128xf32, #tpu.memory_space<vmem>>, vector<1x64xf32>
    %301 = arith.truncf %298 : vector<16x32xf32> to vector<16x32xbf16>
    %cst_112 = arith.constant dense<0.000000e+00> : vector<16x64xf32>
    %302 = tpu.matmul %301, %299, %cst_112 {dimension_numbers = #tpu.dot_dimension_numbers<[1], [0], [0], [1], [0, 0, 1, 1], [], []>} : vector<16x32xbf16>, vector<32x64xbf16>, vector<16x64xf32> -> vector<16x64xf32>
    %303 = vector.broadcast %300 : vector<1x64xf32> to vector<16x64xf32>
    %304 = arith.addf %302, %303 : vector<16x64xf32>
    %305 = arith.mulf %304, %304 : vector<16x64xf32>
    %306 = arith.mulf %304, %305 : vector<16x64xf32>
    %cst_113 = arith.constant 4.471500e-02 : f32
    %307 = vector.broadcast %cst_113 : f32 to vector<16x64xf32>
    %308 = arith.mulf %307, %306 : vector<16x64xf32>
    %309 = arith.addf %304, %308 : vector<16x64xf32>
    %cst_114 = arith.constant 0.797884583 : f32
    %310 = vector.broadcast %cst_114 : f32 to vector<16x64xf32>
    %311 = arith.mulf %310, %309 : vector<16x64xf32>
    %312 = math.tanh %311 : vector<16x64xf32>
    %cst_115 = arith.constant 1.000000e+00 : f32
    %313 = vector.broadcast %cst_115 : f32 to vector<16x64xf32>
    %314 = arith.addf %313, %312 : vector<16x64xf32>
    %cst_116 = arith.constant 5.000000e-01 : f32
    %315 = vector.broadcast %cst_116 : f32 to vector<16x64xf32>
    %316 = arith.mulf %315, %314 : vector<16x64xf32>
    %317 = arith.mulf %304, %316 : vector<16x64xf32>
    %c768 = arith.constant 768 : index
    %c0_117 = arith.constant 0 : index
    %318 = vector.load %arg1[%c768, %c0_117] : memref<864x128xbf16, #tpu.memory_space<vmem>>, vector<64x32xbf16>
    %c44 = arith.constant 44 : index
    %c0_118 = arith.constant 0 : index
    %319 = vector.load %arg2[%c44, %c0_118] : memref<48x128xf32, #tpu.memory_space<vmem>>, vector<1x32xf32>
    %320 = arith.truncf %317 : vector<16x64xf32> to vector<16x64xbf16>
    %cst_119 = arith.constant dense<0.000000e+00> : vector<16x32xf32>
    %321 = tpu.matmul %320, %318, %cst_119 {dimension_numbers = #tpu.dot_dimension_numbers<[1], [0], [0], [1], [0, 0, 1, 1], [], []>} : vector<16x64xbf16>, vector<64x32xbf16>, vector<16x32xf32> -> vector<16x32xf32>
    %322 = arith.addf %274, %321 : vector<16x32xf32>
    %323 = vector.broadcast %319 : vector<1x32xf32> to vector<16x32xf32>
    %324 = arith.addf %322, %323 : vector<16x32xf32>
    %c8 = arith.constant 8 : index
    %c0_120 = arith.constant 0 : index
    %325 = vector.load %arg2[%c8, %c0_120] : memref<48x128xf32, #tpu.memory_space<vmem>>, vector<1x32xf32>
    %c9 = arith.constant 9 : index
    %c0_121 = arith.constant 0 : index
    %326 = vector.load %arg2[%c9, %c0_121] : memref<48x128xf32, #tpu.memory_space<vmem>>, vector<1x32xf32>
    %cst_122 = arith.constant dense<0.000000e+00> : vector<16xf32>
    %327 = vector.multi_reduction <add>, %324, %cst_122 [1] : vector<16x32xf32> to vector<16xf32>
    %328 = vector.shape_cast %327 : vector<16xf32> to vector<16x1xf32>
    %cst_123 = arith.constant 3.200000e+01 : f32
    %329 = vector.broadcast %cst_123 : f32 to vector<16x1xf32>
    %330 = arith.divf %328, %329 : vector<16x1xf32>
    %331 = vector.broadcast %330 : vector<16x1xf32> to vector<16x32xf32>
    %332 = arith.subf %324, %331 : vector<16x32xf32>
    %333 = arith.mulf %332, %332 : vector<16x32xf32>
    %cst_124 = arith.constant dense<0.000000e+00> : vector<16xf32>
    %334 = vector.multi_reduction <add>, %333, %cst_124 [1] : vector<16x32xf32> to vector<16xf32>
    %335 = vector.shape_cast %334 : vector<16xf32> to vector<16x1xf32>
    %cst_125 = arith.constant 3.200000e+01 : f32
    %336 = vector.broadcast %cst_125 : f32 to vector<16x1xf32>
    %337 = arith.divf %335, %336 : vector<16x1xf32>
    %338 = vector.broadcast %330 : vector<16x1xf32> to vector<16x32xf32>
    %339 = arith.subf %324, %338 : vector<16x32xf32>
    %cst_126 = arith.constant 9.99999974E-6 : f32
    %340 = vector.broadcast %cst_126 : f32 to vector<16x1xf32>
    %341 = arith.addf %337, %340 : vector<16x1xf32>
    %342 = math.rsqrt %341 : vector<16x1xf32>
    %343 = vector.broadcast %342 : vector<16x1xf32> to vector<16x32xf32>
    %344 = arith.mulf %339, %343 : vector<16x32xf32>
    %345 = vector.broadcast %325 : vector<1x32xf32> to vector<16x32xf32>
    %346 = arith.mulf %344, %345 : vector<16x32xf32>
    %347 = vector.broadcast %326 : vector<1x32xf32> to vector<16x32xf32>
    %348 = arith.addf %346, %347 : vector<16x32xf32>
    %349 = tpu.iota {dimensions = array<i32: 0>} : vector<8x16xi32>
    %350 = tpu.iota {dimensions = array<i32: 1>} : vector<8x16xi32>
    %c3_i32_127 = arith.constant 3 : i32
    %351 = vector.broadcast %c3_i32_127 : i32 to vector<8x16xi32>
    %352 = arith.shrsi %350, %351 : vector<8x16xi32>
    %353 = arith.cmpi eq, %349, %352 : vector<8x16xi32>
    %c7_i32_128 = arith.constant 7 : i32
    %354 = vector.broadcast %c7_i32_128 : i32 to vector<8x16xi32>
    %355 = arith.andi %350, %354 : vector<8x16xi32>
    %c5_i32_129 = arith.constant 5 : i32
    %356 = vector.broadcast %c5_i32_129 : i32 to vector<8x16xi32>
    %357 = arith.cmpi slt, %355, %356 : vector<8x16xi32>
    %358 = arith.andi %353, %357 : vector<8x16xi1>
    %cst_130 = arith.constant 1.000000e+00 : f32
    %cst_131 = arith.constant 0.000000e+00 : f32
    %359 = vector.broadcast %cst_130 : f32 to vector<8x16xf32>
    %360 = vector.broadcast %cst_131 : f32 to vector<8x16xf32>
    %361 = arith.select %358, %359, %360 : vector<8x16xi1>, vector<8x16xf32>
    %362 = arith.truncf %361 : vector<8x16xf32> to vector<8x16xbf16>
    %363 = arith.truncf %348 : vector<16x32xf32> to vector<16x32xbf16>
    %cst_132 = arith.constant dense<0.000000e+00> : vector<8x32xf32>
    %364 = tpu.matmul %362, %363, %cst_132 {dimension_numbers = #tpu.dot_dimension_numbers<[1], [0], [0], [1], [0, 0, 1, 1], [], []>} : vector<8x16xbf16>, vector<16x32xbf16>, vector<8x32xf32> -> vector<8x32xf32>
    %cst_133 = arith.constant 2.000000e-01 : f32
    %365 = vector.broadcast %cst_133 : f32 to vector<8x32xf32>
    %366 = arith.mulf %364, %365 : vector<8x32xf32>
    %c832 = arith.constant 832 : index
    %c0_134 = arith.constant 0 : index
    %367 = vector.load %arg1[%c832, %c0_134] : memref<864x128xbf16, #tpu.memory_space<vmem>>, vector<32x128xbf16>
    %c10 = arith.constant 10 : index
    %c0_135 = arith.constant 0 : index
    %368 = vector.load %arg2[%c10, %c0_135] : memref<48x128xf32, #tpu.memory_space<vmem>>, vector<1x128xf32>
    %369 = arith.truncf %366 : vector<8x32xf32> to vector<8x32xbf16>
    %cst_136 = arith.constant dense<0.000000e+00> : vector<8x128xf32>
    %370 = tpu.matmul %369, %367, %cst_136 {dimension_numbers = #tpu.dot_dimension_numbers<[1], [0], [0], [1], [0, 0, 1, 1], [], []>} : vector<8x32xbf16>, vector<32x128xbf16>, vector<8x128xf32> -> vector<8x128xf32>
    %371 = vector.broadcast %368 : vector<1x128xf32> to vector<8x128xf32>
    %372 = arith.addf %370, %371 : vector<8x128xf32>
    %c0_137 = arith.constant 0 : index
    %c0_138 = arith.constant 0 : index
    %373 = vector.load %arg3[%c0_137, %c0_138] : memref<8x128xf32, #tpu.memory_space<vmem>>, vector<8x128xf32>
    tpu.vector_store %arg3[%c0_137, %c0_138], %372 {strides = array<i32>} : memref<8x128xf32, #tpu.memory_space<vmem>>, vector<8x128xf32>,
    return
  }
}

</mosaic_0001>

<bundles_post_ra>
// kernel: full_model_forward.1
= control target key start
LH: loop header
LB: loop body
LE: loop exit
PB: predicated region body
PF: predicated region fallthrough
CT: control target
= control target key end

     0   :  { %vm118_vm0 = vcmask 523264   ;;  %vm166_vm1 = vcmask 261120   ;;  %v1878_v29 = vmov 32.0   ;;  %vm326_vm9 = vcmask 130048   ;;  %s1879_s5 = smov 16   ;;  %s2345_s1 = inlined_call_operand.vmem [shape: bf16[864,128], index: 1, kind: input, shape index: {}]   ;;  %s2346_s0 = inlined_call_operand.vmem [shape: f32[16,192], index: 0, kind: input, shape index: {}]   ;;  %s2347_s2 = inlined_call_operand.vmem [shape: f32[48,128], index: 2, kind: input, shape index: {}]   ;;  %s2348_s3 = inlined_call_operand.vmem [shape: f32[8,128], index: 3, kind: output, shape index: {}]  }
   0x1   :  { %v1727_v0 = vld [vmem:[%s2345_s1 + $0x38] sm:$0xff]  ;;  %v1726_v2 = vld [vmem:[%s2345_s1 + $0x30] sm:$0xff]  ;;  %v1725_v4 = vld [vmem:[%s2345_s1 + $0x28] sm:$0xff]  ;;  %1816 = vrcp.f32 %v1878_v29 }
   0x2   :  { %v1731_v1 = vld [vmem:[%s2345_s1 + $0x58] sm:$0xff]  ;;  %122 = vmatpush.bf16.msra.mxu0 %v1727_v0  ;;  %v1730_v3 = vld [vmem:[%s2345_s1 + $0x50] sm:$0xff]  ;;  %v1729_v5 = vld [vmem:[%s2345_s1 + $0x48] sm:$0xff] }
   0x3   :  { %140 = vmatpush.bf16.msra.mxu1 %v1731_v1  ;;  %v1724_v6 = vld [vmem:[%s2345_s1 + $0x20] sm:$0xff]  ;;  %v40_v8 = vld [vmem:[%s2346_s0 + $0x8] sm:$0xff]  ;;  %v42_v9 = vld [vmem:[%s2346_s0 + $0x18] sm:$0xff] }
   0x4   :  { %v1728_v7 = vld [vmem:[%s2345_s1 + $0x40] sm:$0xff]  ;;  %v1723_v10 = vld [vmem:[%s2345_s1 + $0x18] sm:$0xff]  ;;  %v44_v11 = vpack.c.bf16 %v42_v9, %v40_v8  ;;  %v1722_v12 = vld [vmem:[%s2345_s1 + $0x10] sm:$0xff] }
   0x5   :  { %v1721_v13 = vld [vmem:[%s2345_s1 + $0x8] sm:$0xff]  ;;  %v1720_v14 = vld [vmem:[%s2345_s1] sm:$0xff]  ;;  %v41_v16 = vld [vmem:[%s2346_s0 + $0x10] sm:$0xff] }
   0x6   :  { %123 = vmatpush.bf16.msra.mxu0 %v1726_v2  ;;  %v39_v15 = vld [vmem:[%s2346_s0] sm:$0xff]  ;;  %v1733_v46 = vld [vmem:[%s2345_s1 + $0x68] sm:$0xff]  ;;  %v1735_v47 = vld [vmem:[%s2345_s1 + $0x78] sm:$0xff] }
   0x7   :  { %141 = vmatpush.bf16.msra.mxu1 %v1730_v3  ;;  %v43_v17 = vpack.c.bf16 %v41_v16, %v39_v15  ;;  %v45_v18 = vld [vmem:[%s2347_s2] sm:$0xff]  ;;  %v1817_v30 = vpop.eup %1816  ;;  %v1743_v48 = vld [vmem:[%s2345_s1 + $0xb8] sm:$0xff]  ;;  %262 = vmatpush.bf16.msra.mxu2 %v1733_v46  ;;  %v1734_v52 = vld [vmem:[%s2345_s1 + $0x70] sm:$0xff] }
   0x8   :  { %v174_v31 = vmul.f32 32.0, %v1817_v30  ;;  %vm178_vm2 = vweird.f32 %v1817_v30  ;;  %289 = vmatpush.bf16.msra.mxu3 %v1735_v47  ;;  %v1732_v51 = vld [vmem:[%s2345_s1 + $0x60] sm:$0xff]  ;;  %v1742_v53 = vld [vmem:[%s2345_s1 + $0xb0] sm:$0xff]  ;;  %v1737_v56 = vld [vmem:[%s2345_s1 + $0x88] sm:$0xff] }
   0x9   :  { %v1736_v58 = vld [vmem:[%s2345_s1 + $0x80] sm:$0xff]  ;;  %v1787_v8 = vld [vmem:[%s2347_s2 + $0x10] ss:$0 sm:$0xff]  ;;  %v1792_v46 = vld [vmem:[%s2347_s2 + $0x16] ss:$0 sm:$0xff] }
   0xa   :  { %124 = vmatpush.bf16.msra.mxu0 %v1725_v4  ;;  %v175_v32 = vsub.f32 1.0, %v174_v31 }
   0xb   :  { %142 = vmatpush.bf16.msra.mxu1 %v1729_v5  ;;  %263 = vmatpush.bf16.msra.mxu2 %v1732_v51  ;;  %v150_v51 = vlaneseq }
   0xc   :  { %v176_v33 = vmul.f32 %v1817_v30, %v175_v32  ;;  %290 = vmatpush.bf16.msra.mxu3 %v1734_v52 }
   0xd   :  { %v151_v52 = vand.u32 127, %v150_v51 }
   0xe   :  { %125 = vmatpush.bf16.msra.mxu0 %v1724_v6  ;;  %v177_v34 = vadd.f32 %v1817_v30, %v176_v33 }
   0xf   :  { %143 = vmatpush.bf16.msra.mxu1 %v1728_v7  ;;  %316 = vmatpush.bf16.msrb.mxu2 %v1737_v56 }
  0x10   :  { %v1961_v35 = vsel %vm178_vm2, %v1817_v30, %v177_v34  ;;  %v1791_v30 = vld [vmem:[%s2347_s2 + $0x14] ss:$0 sm:$0xff] }
  0x12   :  { %126 = vmatpush.bf16.msra.mxu0 %v1723_v10  ;;  %1523 = vmatmul.msk.bf16.vlgmr.msra.gmra.mxu1 %vm118_vm0, %v44_v11 }
  0x13   :  { %317 = vmatpush.bf16.msrb.mxu2 %v1736_v58 }
  0x16   :  { %127 = vmatpush.bf16.msra.mxu0 %v1722_v12  ;;  %v1788_v12 = vld [vmem:[%s2347_s2 + $0x11] ss:$0 sm:$0xff] }
  0x1a   :  { %128 = vmatpush.bf16.msra.mxu0 %v1721_v13 }
  0x1e   :  { %129 = vmatpush.bf16.msra.mxu0 %v1720_v14 }
  0x21   :  { %130 = vmatmul.bf16.vlgmr.msra.gmra.mxu0 %v43_v17 }
  0x22   :  { %480 = vmatpush.bf16.msrb.mxu0 %v1743_v48 }
  0x26   :  { %481 = vmatpush.bf16.msrb.mxu0 %v1742_v53  ;;  %v160_v53 = vand.u32 7, %v151_v52 }
  0x28   :  { %vm2033_vm10 = vcmp.lt.s32.totalorder %v160_v53, 5 }
  0x8f   :  { %v145_v19 = vpop.f32.mrf.mxu1 }
  0x97   :  { %v147_v26 = vpop.f32.mrf.mxu1 }
  0x9e   :  { %v131_v20 = vpop.f32.mrf.mxu0 }
  0x9f   :  { %v132_v21 = vadd.f32 %v131_v20, %v45_v18  ;;  %v1738_v20 = vld [vmem:[%s2345_s1 + $0x90] sm:$0xff] }
  0xa1   :  { %v1953_v22 = vadd.f32 %v145_v19, %v132_v21 }
  0xa3   :  { %v167_v23 = vsel %vm166_vm1, %v1953_v22, 0.0 }
  0xa4   :  { %168 = vadd.xlane.f32.xlu0 %v167_v23  ;;  %v1789_v23 = vld [vmem:[%s2347_s2 + $0x17] ss:$0 sm:$0xff] }
  0xa6   :  { %v133_v24 = vpop.f32.mrf.mxu0 }
  0xa7   :  { %v134_v25 = vadd.f32 %v133_v24, %v45_v18  ;;  %v1739_v18 = vld [vmem:[%s2345_s1 + $0x98] sm:$0xff] }
  0xa9   :  { %v1957_v27 = vadd.f32 %v147_v26, %v134_v25 }
  0xab   :  { %v170_v28 = vsel %vm166_vm1, %v1957_v27, 0.0 }
  0xac   :  { %171 = vadd.xlane.f32.xlu0 %v170_v28 }
 0x117   :  { %v169_v36 = vpop.xlane.xlu0 %168 }
 0x118   :  { %v180_v37 = vmul.f32 %v1961_v35, %v169_v36 }
 0x11a   :  { %v182_v38 = vsub.f32 %v1953_v22, %v180_v37 }
 0x11c   :  { %v184_v39 = vmul.f32 %v182_v38, %v182_v38 }
 0x11e   :  { %v186_v40 = vsel %vm166_vm1, %v184_v39, 0.0  ;;  %v1790_v39 = vld [vmem:[%s2347_s2 + $0x12] ss:$0 sm:$0xff] }
 0x11f   :  { %187 = vadd.xlane.f32.xlu1 %v186_v40  ;;  %v172_v41 = vpop.xlane.xlu0 %171 }
 0x120   :  { %v181_v42 = vmul.f32 %v1961_v35, %v172_v41 }
 0x122   :  { %v183_v43 = vsub.f32 %v1957_v27, %v181_v42  ;;  %v1740_v42 = vld [vmem:[%s2345_s1 + $0xa0] sm:$0xff] }
 0x124   :  { %v185_v44 = vmul.f32 %v183_v43, %v183_v43 }
 0x126   :  { %v189_v45 = vsel %vm166_vm1, %v185_v44, 0.0 }
 0x127   :  { %190 = vadd.xlane.f32.xlu1 %v189_v45 }
 0x192   :  { %v188_v49 = vpop.xlane.xlu1 %187 }
 0x193   :  { %v192_v50 = vmul.f32 %v188_v49, %v1961_v35 }
 0x195   :  { %v194_v54 = vadd.f32 1e-05, %v192_v50 }
 0x197   :  { %1818 = vrsqrt.f32 %v194_v54  ;;  %vm202_vm4 = vweird.f32 %v194_v54 }
 0x19a   :  { %v191_v55 = vpop.xlane.xlu1 %190 }
 0x19b   :  { %v193_v57 = vmul.f32 %v191_v55, %v1961_v35  ;;  %v157_v55 = vshra.s32 %v151_v52, 3 }
 0x19d   :  { %v1819_v59 = vpop.eup %1818  ;;  %v195_v60 = vadd.f32 1e-05, %v193_v57  ;;  %v1815_v57 = vld [vmem:[%s2347_s2 + $0xa] ss:$0 sm:$0xff] }
 0x19e   :  { %v197_v61 = vmul.f32 %v1819_v59, %v194_v54  ;;  %vm203_vm3 = vweird.f32 %v1819_v59  ;;  %v153_v54 = vshrl.u32 %v150_v51, 7 }
 0x19f   :  { %1820 = vrsqrt.f32 %v195_v60  ;;  %vm204_vm5 = vmor %vm202_vm4, %vm203_vm3  ;;  %vm212_vm7 = vweird.f32 %v195_v60 }
 0x1a0   :  { %v198_v62 = vmul.f32 %v1819_v59, %v197_v61  ;;  %vm1413_vm11 = vcmp.eq.s32.totalorder %v153_v54, %v157_v55  ;;  %v155_v58 = vshra.s32 %v153_v54, 3 }
 0x1a1   :  { %vm2039_vm12 = vmand %vm1413_vm11, %vm2033_vm10 }
 0x1a2   :  { %v199_v63 = vmul.f32 0.5, %v198_v62  ;;  %vm158_vm13 = vcmp.eq.s32.totalorder %v155_v58, %v157_v55 }
 0x1a3   :  { %vm2045_vm14 = vmand %vm158_vm13, %vm2033_vm10 }
 0x1a4   :  { %v200_v0 = vsub.f32 1.5, %v199_v63 }
 0x1a5   :  { %v1821_v1 = vpop.eup %1820 }
 0x1a6   :  { %v201_v2 = vmul.f32 %v1819_v59, %v200_v0  ;;  %v207_v3 = vmul.f32 %v1821_v1, %v195_v60  ;;  %vm213_vm6 = vweird.f32 %v1821_v1 }
 0x1a7   :  { %vm214_vm8 = vmor %vm212_vm7, %vm213_vm6 }
 0x1a8   :  { %v208_v4 = vmul.f32 %v1821_v1, %v207_v3  ;;  %v205_v5 = vsel %vm204_vm5, %v1819_v59, %v201_v2  ;;  %v154_v59 = vadd.s32 8, %v153_v54 }
 0x1a9   :  { %v216_v9 = vmul.f32 %v205_v5, %v182_v38  ;;  %v1741_v38 = vld [vmem:[%s2345_s1 + $0xa8] sm:$0xff] }
 0x1aa   :  { %v209_v6 = vmul.f32 0.5, %v208_v4  ;;  %v156_v63 = vshra.s32 %v154_v59, 3 }
 0x1ab   :  { %v219_v13 = vmul.f32 %v1787_v8, %v216_v9 }
 0x1ac   :  { %v210_v7 = vsub.f32 1.5, %v209_v6  ;;  %vm159_vm15 = vcmp.eq.s32.totalorder %v156_v63, %v157_v55 }
 0x1ad   :  { %v222_v16 = vadd.f32 %v1788_v12, %v219_v13  ;;  %vm2054_vm2 = vmand %vm159_vm15, %vm2033_vm10 }
 0x1ae   :  { %v211_v10 = vmul.f32 %v1821_v1, %v210_v7 }
 0x1b0   :  { %v215_v11 = vsel %vm214_vm8, %v1821_v1, %v211_v10 }
 0x1b1   :  { %v217_v14 = vmul.f32 %v215_v11, %v183_v43 }
 0x1b3   :  { %v220_v15 = vmul.f32 %v1787_v8, %v217_v14  ;;  %v1794_v8 = vld [vmem:[%s2347_s2 + $0x15] ss:$0 sm:$0xff] }
 0x1b5   :  { %v223_v17 = vadd.f32 %v1788_v12, %v220_v15 }
 0x1b7   :  { %v224_v19 = vpack.c.bf16 %v223_v17, %v222_v16 }
 0x1b9   :  { %1532 = vmatmul.msk.bf16.vlgmr.msra.gmra.mxu2 %vm166_vm1, %v224_v19  ;;  %1541 = vmatmul.msk.bf16.vlgmr.msra.gmra.mxu3 %vm166_vm1, %v224_v19 }
 0x1ba   :  { %1579 = vmatmul.msk.bf16.vlgmr.msrb.gmra.mxu0 %vm166_vm1, %v224_v19  ;;  %426 = vmatpush.bf16.msra.mxu2 %v1739_v18 }
 0x1be   :  { %427 = vmatpush.bf16.msra.mxu2 %v1738_v20 }
 0x1c9   :  { %1550 = vmatmul.msk.bf16.vlgmr.msrb.gmra.mxu2 %vm166_vm1, %v224_v19 }
 0x1d9   :  { %1561 = vmatmul.msk.bf16.vlgmr.msra.gmra.mxu2 %vm166_vm1, %v224_v19 }
 0x237   :  { %v483_v21 = vpop.f32.mrf.mxu0 }
 0x238   :  { %v484_v28 = vadd.f32 %v1789_v23, %v483_v21 }
 0x23c   :  { %v265_v24 = vpop.f32.mrf.mxu2  ;;  %v292_v25 = vpop.f32.mrf.mxu3 }
 0x23d   :  { %v293_v34 = vadd.f32 %v1791_v30, %v292_v25  ;;  %v266_v44 = vadd.f32 %v1790_v39, %v265_v24 }
 0x23f   :  { %v485_v26 = vpop.f32.mrf.mxu0 }
 0x240   :  { %v486_v29 = vadd.f32 %v1789_v23, %v485_v26 }
 0x242   :  { %v537_v31 = vpack.c.bf16 %v486_v29, %v484_v28 }
 0x244   :  { %548 = vmatpush.bf16.msrb.mxu2 %v537_v31  ;;  %v267_v32 = vpop.f32.mrf.mxu2  ;;  %v294_v33 = vpop.f32.mrf.mxu3 }
 0x245   :  { %v295_v36 = vadd.f32 %v1791_v30, %v294_v33  ;;  %v268_v41 = vadd.f32 %v1790_v39, %v267_v32 }
 0x247   :  { %v325_v37 = vpack.c.bf16 %v295_v36, %v293_v34  ;;  %v324_v45 = vpack.c.bf16 %v268_v41, %v266_v44  ;;  %v1793_v36 = vld [vmem:[%s2347_s2 + $0x13] ss:$0 sm:$0xff] }
 0x249   :  { %v331_v40 = vsel %vm326_vm9, %v325_v37, 0 }
 0x24a   :  { %340 = vmatpush.bf16.xpose.msrb.mxu3 %v331_v40 }
 0x24c   :  { %v319_v43 = vpop.f32.mrf.mxu2 }
 0x24d   :  { %v320_v48 = vadd.f32 %v1792_v46, %v319_v43 }
 0x251   :  { %1551 = vmatmul.msk.bf16.vlgmr.msrb.gmra.mxu3 %vm326_vm9, %v324_v45 }
 0x252   :  { %453 = vmatpush.bf16.msra.mxu3 %v1741_v38 }
 0x254   :  { %v321_v47 = vpop.f32.mrf.mxu2 }
 0x255   :  { %v322_v49 = vadd.f32 %v1792_v46, %v321_v47 }
 0x256   :  { %454 = vmatpush.bf16.msra.mxu3 %v1740_v42 }
 0x257   :  { %v374_v50 = vpack.c.bf16 %v322_v49, %v320_v48 }
 0x259   :  { %385 = vmatpush.bf16.msrb.mxu1 %v374_v50 }
 0x25c   :  { %v429_v32 = vpop.f32.mrf.mxu2 }
 0x25d   :  { %v430_v38 = vadd.f32 %v1793_v36, %v429_v32 }
 0x261   :  { %1570 = vmatmul.msk.bf16.vlgmr.msra.gmra.mxu3 %vm166_vm1, %v224_v19 }
 0x264   :  { %v431_v34 = vpop.f32.mrf.mxu2 }
 0x265   :  { %v432_v37 = vadd.f32 %v1793_v36, %v431_v34 }
 0x267   :  { %v488_v39 = vpack.c.bf16 %v432_v37, %v430_v38  ;;  %v1747_v37 = vld [vmem:[%s2345_s1 + $0xd8] sm:$0xff] }
 0x268   :  { %685 = vmatpush.bf16.msra.mxu0 %v1747_v37 }
 0x2d4   :  { %v342_v60 = vpop.f32.mrf.mxu3 }
 0x2d5   :  { %v347_v62 = vmul.f32 0.25, %v342_v60 }
 0x2d7   :  { %v349_v0 = vsel %vm2045_vm14, %v347_v62, -1e+30 }
 0x2d8   :  { %v351_v1 = vsel %vm326_vm9, %v349_v0, -inf }
 0x2d9   :  { %352 = vmax.xlane.f32.xlu2 %v351_v1 }
 0x2dc   :  { %v344_v2 = vpop.f32.mrf.mxu3 }
 0x2dd   :  { %v348_v4 = vmul.f32 0.25, %v344_v2 }
 0x2df   :  { %v350_v5 = vsel %vm2054_vm2, %v348_v4, -1e+30 }
 0x2e0   :  { %v354_v6 = vsel %vm326_vm9, %v350_v5, -inf }
 0x2e1   :  { %355 = vmax.xlane.f32.xlu2 %v354_v6  ;;  %v1745_v6 = vld [vmem:[%s2345_s1 + $0xc8] sm:$0xff] }
 0x2e2   :  { %592 = vmatpush.bf16.msrb.mxu3 %v1745_v6 }
 0x2e4   :  { %v456_v7 = vpop.f32.mrf.mxu3 }
 0x2e5   :  { %v457_v10 = vadd.f32 %v1794_v8, %v456_v7 }
 0x2ec   :  { %v458_v9 = vpop.f32.mrf.mxu3 }
 0x2ed   :  { %v459_v11 = vadd.f32 %v1794_v8, %v458_v9 }
 0x2ef   :  { %v489_v12 = vpack.c.bf16 %v459_v11, %v457_v10  ;;  %v1744_v10 = vld [vmem:[%s2345_s1 + $0xc0] sm:$0xff] }
 0x2f0   :  { %593 = vmatpush.bf16.msrb.mxu3 %v1744_v10  ;;  %v1798_v10 = vld [vmem:[%s2347_s2 + $0x1b] ss:$0 sm:$0xff] }
 0x2f1   :  { %v494_v13 = vsel %vm326_vm9, %v489_v12, 0 }
 0x2f2   :  { %503 = vmatpush.bf16.xpose.msra.mxu1 %v494_v13 }
 0x34c   :  { %v353_v14 = vpop.xlane.xlu2 %352 }
 0x34d   :  { %v357_v15 = vsub.f32 %v349_v0, %v353_v14 }
 0x34f   :  { %v359_v16 = vmul.f32 1.442695, %v357_v15 }
 0x351   :  { %1822 = vpow2.f32 %v359_v16 }
 0x354   :  { %v356_v17 = vpop.xlane.xlu2 %355 }
 0x355   :  { %v358_v18 = vsub.f32 %v350_v5, %v356_v17  ;;  %v1795_v17 = vld [vmem:[%s2347_s2 + $0x18] ss:$0 sm:$0xff] }
 0x357   :  { %v1823_v19 = vpop.eup %1822  ;;  %v361_v20 = vmul.f32 1.442695, %v358_v18 }
 0x358   :  { %v363_v21 = vsel %vm326_vm9, %v1823_v19, 0.0 }
 0x359   :  { %1824 = vpow2.f32 %v361_v20  ;;  %364 = vadd.xlane.f32.xlu0 %v363_v21 }
 0x35f   :  { %v1825_v23 = vpop.eup %1824 }
 0x360   :  { %v366_v24 = vsel %vm326_vm9, %v1825_v23, 0.0 }
 0x361   :  { %367 = vadd.xlane.f32.xlu1 %v366_v24 }
 0x3cc   :  { %v365_v25 = vpop.xlane.xlu0 %364 }
 0x3cd   :  { %1826 = vrcp.f32 %v365_v25 }
 0x3d3   :  { %v1827_v28 = vpop.eup %1826 }
 0x3d4   :  { %v368_v26 = vpop.xlane.xlu1 %367  ;;  %v371_v30 = vmul.f32 %v1827_v28, %v1823_v19 }
 0x3d5   :  { %1828 = vrcp.f32 %v368_v26 }
 0x3db   :  { %v1829_v29 = vpop.eup %1828 }
 0x3dc   :  { %v372_v31 = vmul.f32 %v1829_v29, %v1825_v23 }
 0x3de   :  { %v373_v33 = vpack.c.bf16 %v372_v31, %v371_v30 }
 0x3e0   :  { %1552 = vmatmul.msk.bf16.vlgmr.msrb.gmra.mxu1 %vm326_vm9, %v373_v33 }
 0x3f0   :  { %1580 = vmatmul.msk.bf16.vlgmr.msra.gmra.mxu1 %vm326_vm9, %v488_v39 }
 0x45d   :  { %v387_v40 = vpop.f32.mrf.mxu1 }
 0x465   :  { %v389_v41 = vpop.f32.mrf.mxu1 }
 0x46d   :  { %v505_v42 = vpop.f32.mrf.mxu1 }
 0x46e   :  { %v510_v43 = vmul.f32 0.25, %v505_v42 }
 0x470   :  { %v512_v44 = vsel %vm2045_vm14, %v510_v43, -1e+30 }
 0x471   :  { %v514_v45 = vsel %vm326_vm9, %v512_v44, -inf }
 0x472   :  { %515 = vmax.xlane.f32.xlu2 %v514_v45 }
 0x475   :  { %v507_v46 = vpop.f32.mrf.mxu1 }
 0x476   :  { %v511_v47 = vmul.f32 0.25, %v507_v46 }
 0x478   :  { %v513_v48 = vsel %vm2054_vm2, %v511_v47, -1e+30 }
 0x479   :  { %v517_v49 = vsel %vm326_vm9, %v513_v48, -inf }
 0x47a   :  { %518 = vmax.xlane.f32.xlu0 %v517_v49 }
 0x4e5   :  { %v516_v50 = vpop.xlane.xlu2 %515 }
 0x4e6   :  { %v520_v51 = vsub.f32 %v512_v44, %v516_v50 }
 0x4e8   :  { %v522_v52 = vmul.f32 1.442695, %v520_v51 }
 0x4ea   :  { %1830 = vpow2.f32 %v522_v52 }
 0x4ed   :  { %v519_v53 = vpop.xlane.xlu0 %518 }
 0x4ee   :  { %v521_v54 = vsub.f32 %v513_v48, %v519_v53 }
 0x4f0   :  { %v1831_v55 = vpop.eup %1830  ;;  %v524_v56 = vmul.f32 1.442695, %v521_v54 }
 0x4f1   :  { %v526_v58 = vsel %vm326_vm9, %v1831_v55, 0.0 }
 0x4f2   :  { %1832 = vpow2.f32 %v524_v56  ;;  %527 = vadd.xlane.f32.xlu1 %v526_v58  ;;  %v1796_v58 = vld [vmem:[%s2347_s2 + $0x19] ss:$0 sm:$0xff] }
 0x4f8   :  { %v1833_v59 = vpop.eup %1832 }
 0x4f9   :  { %v529_v60 = vsel %vm326_vm9, %v1833_v59, 0.0 }
 0x4fa   :  { %530 = vadd.xlane.f32.xlu2 %v529_v60 }
 0x565   :  { %v528_v62 = vpop.xlane.xlu1 %527 }
 0x566   :  { %1834 = vrcp.f32 %v528_v62 }
 0x56c   :  { %v1835_v0 = vpop.eup %1834 }
 0x56d   :  { %v531_v63 = vpop.xlane.xlu2 %530  ;;  %v534_v2 = vmul.f32 %v1835_v0, %v1831_v55 }
 0x56e   :  { %1836 = vrcp.f32 %v531_v63  ;;  %v1797_v63 = vld [vmem:[%s2347_s2 + $0x1a] ss:$0 sm:$0xff] }
 0x574   :  { %v1837_v1 = vpop.eup %1836 }
 0x575   :  { %v535_v4 = vmul.f32 %v1837_v1, %v1833_v59 }
 0x577   :  { %v536_v5 = vpack.c.bf16 %v535_v4, %v534_v2 }
 0x579   :  { %1581 = vmatmul.msk.bf16.vlgmr.msrb.gmra.mxu2 %vm326_vm9, %v536_v5 }
 0x5fc   :  { %v550_v7 = vpop.f32.mrf.mxu2 }
 0x604   :  { %v552_v8 = vpop.f32.mrf.mxu2 }
 0x605   :  { %v1777_v9 = vpack.i.bf16 %v552_v8, %v550_v7  ;;  %v1751_v7 = vld [vmem:[%s2345_s1 + $0xf8] sm:$0xff]  ;;  %v1750_v8 = vld [vmem:[%s2345_s1 + $0xf0] sm:$0xff] }
 0x606   :  { %752 = vmatpush.bf16.msrb.mxu1 %v1751_v7  ;;  %v1758_v7 = vld [vmem:[%s2345_s1 + $0x130] sm:$0xff] }
 0x607   :  { %1778 = vrot.lane.b32.xlu0 %v1777_v9, %s1879_s5  ;;  %v1749_v9 = vld [vmem:[%s2345_s1 + $0xe8] sm:$0xff] }
 0x60a   :  { %753 = vmatpush.bf16.msrb.mxu1 %v1750_v8  ;;  %v1760_v8 = vld [vmem:[%s2345_s1 + $0x140] sm:$0xff] }
 0x60e   :  { %754 = vmatpush.bf16.msrb.mxu1 %v1749_v9 }
 0x679   :  { %v1779_v11 = vpop.permute.xlu0 %1778 }
 0x67a   :  { %v1781_v12 = vunpack.i.h.bf16 %v1779_v11  ;;  %v1780_v13 = vunpack.i.l.bf16 %v1779_v11 }
 0x67c   :  { %v564_v14 = vsel %vm326_vm9, %v389_v41, %v1781_v12  ;;  %v563_v15 = vsel %vm326_vm9, %v387_v40, %v1780_v13  ;;  %v1746_v41 = vld [vmem:[%s2345_s1 + $0xd0] sm:$0xff]  ;;  %v1748_v12 = vld [vmem:[%s2345_s1 + $0xe0] sm:$0xff] }
 0x67d   :  { %v570_v16 = vpack.c.bf16 %v564_v14, %v563_v15  ;;  %686 = vmatpush.bf16.msra.mxu0 %v1746_v41  ;;  %755 = vmatpush.bf16.msrb.mxu1 %v1748_v12 }
 0x67f   :  { %1590 = vmatmul.msk.bf16.vlgmr.msrb.gmra.mxu3 %vm166_vm1, %v570_v16 }
 0x702   :  { %v595_v18 = vpop.f32.mrf.mxu3 }
 0x703   :  { %v600_v19 = vadd.f32 %v595_v18, %v1953_v22 }
 0x705   :  { %v2095_v20 = vadd.f32 %v1795_v17, %v600_v19 }
 0x707   :  { %v607_v21 = vsel %vm166_vm1, %v2095_v20, 0.0 }
 0x708   :  { %608 = vadd.xlane.f32.xlu1 %v607_v21 }
 0x70a   :  { %v597_v23 = vpop.f32.mrf.mxu3 }
 0x70b   :  { %v601_v24 = vadd.f32 %v597_v23, %v1957_v27 }
 0x70d   :  { %v2100_v25 = vadd.f32 %v1795_v17, %v601_v24 }
 0x70f   :  { %v610_v26 = vsel %vm166_vm1, %v2100_v25, 0.0 }
 0x710   :  { %611 = vadd.xlane.f32.xlu2 %v610_v26 }
 0x77b   :  { %v609_v28 = vpop.xlane.xlu1 %608 }
 0x77c   :  { %v613_v29 = vmul.f32 %v609_v28, %v1961_v35 }
 0x77e   :  { %v615_v22 = vsub.f32 %v2095_v20, %v613_v29 }
 0x780   :  { %v617_v30 = vmul.f32 %v615_v22, %v615_v22 }
 0x782   :  { %v619_v31 = vsel %vm166_vm1, %v617_v30, 0.0 }
 0x783   :  { %620 = vadd.xlane.f32.xlu1 %v619_v31  ;;  %v612_v32 = vpop.xlane.xlu2 %611 }
 0x784   :  { %v614_v33 = vmul.f32 %v612_v32, %v1961_v35 }
 0x786   :  { %v616_v27 = vsub.f32 %v2100_v25, %v614_v33 }
 0x788   :  { %v618_v34 = vmul.f32 %v616_v27, %v616_v27 }
 0x78a   :  { %v622_v36 = vsel %vm166_vm1, %v618_v34, 0.0 }
 0x78b   :  { %623 = vadd.xlane.f32.xlu2 %v622_v36 }
 0x7f6   :  { %v621_v38 = vpop.xlane.xlu1 %620 }
 0x7f7   :  { %v625_v39 = vmul.f32 %v621_v38, %v1961_v35  ;;  %v1799_v38 = vld [vmem:[%s2347_s2 + $0x1c] ss:$0 sm:$0xff] }
 0x7f9   :  { %v627_v40 = vadd.f32 1e-05, %v625_v39 }
 0x7fb   :  { %1838 = vrsqrt.f32 %v627_v40  ;;  %vm635_vm4 = vweird.f32 %v627_v40 }
 0x7fe   :  { %v624_v42 = vpop.xlane.xlu2 %623 }
 0x7ff   :  { %v626_v43 = vmul.f32 %v624_v42, %v1961_v35 }
 0x801   :  { %v1839_v44 = vpop.eup %1838  ;;  %v628_v45 = vadd.f32 1e-05, %v626_v43 }
 0x802   :  { %v630_v46 = vmul.f32 %v1839_v44, %v627_v40  ;;  %vm636_vm3 = vweird.f32 %v1839_v44 }
 0x803   :  { %1840 = vrsqrt.f32 %v628_v45  ;;  %vm637_vm5 = vmor %vm635_vm4, %vm636_vm3  ;;  %vm645_vm7 = vweird.f32 %v628_v45 }
 0x804   :  { %v631_v47 = vmul.f32 %v1839_v44, %v630_v46 }
 0x806   :  { %v632_v48 = vmul.f32 0.5, %v631_v47 }
 0x808   :  { %v633_v49 = vsub.f32 1.5, %v632_v48 }
 0x809   :  { %v1841_v50 = vpop.eup %1840 }
 0x80a   :  { %v634_v51 = vmul.f32 %v1839_v44, %v633_v49  ;;  %v640_v52 = vmul.f32 %v1841_v50, %v628_v45  ;;  %vm646_vm6 = vweird.f32 %v1841_v50 }
 0x80b   :  { %vm647_vm8 = vmor %vm645_vm7, %vm646_vm6 }
 0x80c   :  { %v641_v53 = vmul.f32 %v1841_v50, %v640_v52  ;;  %v638_v54 = vsel %vm637_vm5, %v1839_v44, %v634_v51 }
 0x80d   :  { %v649_v59 = vmul.f32 %v638_v54, %v615_v22 }
 0x80e   :  { %v642_v55 = vmul.f32 0.5, %v641_v53 }
 0x80f   :  { %v652_v0 = vmul.f32 %v1796_v58, %v649_v59 }
 0x810   :  { %v643_v56 = vsub.f32 1.5, %v642_v55  ;;  %v1753_v55 = vld [vmem:[%s2345_s1 + $0x108] sm:$0xff] }
 0x811   :  { %v655_v4 = vadd.f32 %v1797_v63, %v652_v0  ;;  %857 = vmatpush.bf16.msra.mxu2 %v1753_v55  ;;  %v1754_v0 = vld [vmem:[%s2345_s1 + $0x110] sm:$0xff] }
 0x812   :  { %v644_v60 = vmul.f32 %v1841_v50, %v643_v56  ;;  %v1755_v56 = vld [vmem:[%s2345_s1 + $0x118] sm:$0xff]  ;;  %v1762_v55 = vld [vmem:[%s2345_s1 + $0x150] sm:$0xff] }
 0x813   :  { %884 = vmatpush.bf16.msra.mxu3 %v1755_v56  ;;  %v1805_v56 = vld [vmem:[%s2347_s2 + $0x25] ss:$0 sm:$0xff] }
 0x814   :  { %v648_v62 = vsel %vm647_vm8, %v1841_v50, %v644_v60 }
 0x815   :  { %v650_v1 = vmul.f32 %v648_v62, %v616_v27 }
 0x817   :  { %v653_v2 = vmul.f32 %v1796_v58, %v650_v1  ;;  %v1757_v58 = vld [vmem:[%s2345_s1 + $0x128] sm:$0xff]  ;;  %v1756_v1 = vld [vmem:[%s2345_s1 + $0x120] sm:$0xff]  ;;  %885 = vmatpush.bf16.msra.mxu3 %v1754_v0 }
 0x818   :  { %911 = vmatpush.bf16.msrb.mxu0 %v1757_v58 }
 0x819   :  { %v656_v5 = vadd.f32 %v1797_v63, %v653_v2  ;;  %v1752_v63 = vld [vmem:[%s2345_s1 + $0x100] sm:$0xff] }
 0x81a   :  { %858 = vmatpush.bf16.msra.mxu2 %v1752_v63 }
 0x81b   :  { %v662_v6 = vpack.c.bf16 %v656_v5, %v655_v4  ;;  %v1759_v4 = vld [vmem:[%s2345_s1 + $0x138] sm:$0xff]  ;;  %v1761_v5 = vld [vmem:[%s2345_s1 + $0x148] sm:$0xff] }
 0x81c   :  { %912 = vmatpush.bf16.msrb.mxu0 %v1756_v1  ;;  %1020 = vmatpush.bf16.msrb.mxu3 %v1759_v4 }
 0x81d   :  { %1599 = vmatmul.msk.bf16.vlgmr.msra.gmra.mxu0 %vm166_vm1, %v662_v6 }
 0x820   :  { %1047 = vmatpush.bf16.msra.mxu0 %v1761_v5  ;;  %1021 = vmatpush.bf16.msrb.mxu3 %v1758_v7 }
 0x824   :  { %1048 = vmatpush.bf16.msra.mxu0 %v1760_v8 }
 0x89a   :  { %v688_v11 = vpop.f32.mrf.mxu0 }
 0x89b   :  { %v689_v13 = vadd.f32 %v1798_v10, %v688_v11 }
 0x89d   :  { %v693_v14 = vmul.f32 %v689_v13, %v689_v13 }
 0x89f   :  { %v695_v15 = vmul.f32 %v693_v14, %v689_v13 }
 0x8a1   :  { %v697_v16 = vmul.f32 0.044715, %v695_v15 }
 0x8a2   :  { %v690_v17 = vpop.f32.mrf.mxu0 }
 0x8a3   :  { %v699_v18 = vadd.f32 %v697_v16, %v689_v13  ;;  %v691_v19 = vadd.f32 %v1798_v10, %v690_v17 }
 0x8a5   :  { %v701_v21 = vmul.f32 0.7978846, %v699_v18  ;;  %v694_v23 = vmul.f32 %v691_v19, %v691_v19 }
 0x8a7   :  { %v696_v24 = vmul.f32 %v694_v23, %v691_v19  ;;  %1842 = vtanh.f32 %v701_v21 }
 0x8a9   :  { %v698_v26 = vmul.f32 0.044715, %v696_v24  ;;  %v1800_v24 = vld [vmem:[%s2347_s2 + $0x20] ss:$0 sm:$0xff] }
 0x8ab   :  { %v700_v28 = vadd.f32 %v698_v26, %v691_v19 }
 0x8ad   :  { %v702_v29 = vmul.f32 0.7978846, %v700_v28  ;;  %v1843_v22 = vpop.eup %1842 }
 0x8ae   :  { %v705_v30 = vadd.f32 1.0, %v1843_v22  ;;  %v1801_v22 = vld [vmem:[%s2347_s2 + $0x21] ss:$0 sm:$0xff] }
 0x8af   :  { %1844 = vtanh.f32 %v702_v29 }
 0x8b0   :  { %v707_v32 = vmul.f32 0.5, %v705_v30 }
 0x8b2   :  { %v709_v34 = vmul.f32 %v707_v32, %v689_v13 }
 0x8b5   :  { %v1845_v31 = vpop.eup %1844 }
 0x8b6   :  { %v706_v33 = vadd.f32 1.0, %v1845_v31 }
 0x8b8   :  { %v708_v27 = vmul.f32 0.5, %v706_v33 }
 0x8ba   :  { %v710_v36 = vmul.f32 %v708_v27, %v691_v19 }
 0x8bc   :  { %v720_v37 = vpack.c.bf16 %v710_v36, %v709_v34 }
 0x8be   :  { %1616 = vmatmul.msk.bf16.vlgmr.msrb.gmra.mxu1 %vm118_vm0, %v720_v37  ;;  %v1802_v37 = vld [vmem:[%s2347_s2 + $0x26] ss:$0 sm:$0xff] }
 0x93b   :  { %v757_v39 = vpop.f32.mrf.mxu1 }
 0x93c   :  { %v762_v40 = vadd.f32 %v757_v39, %v2095_v20 }
 0x93e   :  { %v2145_v41 = vadd.f32 %v1799_v38, %v762_v40 }
 0x940   :  { %v769_v42 = vsel %vm166_vm1, %v2145_v41, 0.0 }
 0x941   :  { %770 = vadd.xlane.f32.xlu1 %v769_v42 }
 0x943   :  { %v759_v43 = vpop.f32.mrf.mxu1 }
 0x944   :  { %v763_v44 = vadd.f32 %v759_v43, %v2100_v25 }
 0x946   :  { %v2150_v45 = vadd.f32 %v1799_v38, %v763_v44  ;;  %v1804_v44 = vld [vmem:[%s2347_s2 + $0x24] ss:$0 sm:$0xff] }
 0x948   :  { %v772_v46 = vsel %vm166_vm1, %v2150_v45, 0.0 }
 0x949   :  { %773 = vadd.xlane.f32.xlu2 %v772_v46 }
 0x9b4   :  { %v771_v47 = vpop.xlane.xlu1 %770 }
 0x9b5   :  { %v775_v48 = vmul.f32 %v771_v47, %v1961_v35 }
 0x9b7   :  { %v777_v20 = vsub.f32 %v2145_v41, %v775_v48 }
 0x9b9   :  { %v779_v49 = vmul.f32 %v777_v20, %v777_v20 }
 0x9bb   :  { %v781_v50 = vsel %vm166_vm1, %v779_v49, 0.0 }
 0x9bc   :  { %782 = vadd.xlane.f32.xlu0 %v781_v50  ;;  %v774_v51 = vpop.xlane.xlu2 %773 }
 0x9bd   :  { %v776_v52 = vmul.f32 %v774_v51, %v1961_v35  ;;  %v1763_v51 = vld [vmem:[%s2345_s1 + $0x158] sm:$0xff] }
 0x9bf   :  { %v778_v25 = vsub.f32 %v2150_v45, %v776_v52 }
 0x9c1   :  { %v780_v53 = vmul.f32 %v778_v25, %v778_v25 }
 0x9c3   :  { %v784_v54 = vsel %vm166_vm1, %v780_v53, 0.0 }
 0x9c4   :  { %785 = vadd.xlane.f32.xlu1 %v784_v54 }
 0xa2f   :  { %v783_v59 = vpop.xlane.xlu0 %782 }
 0xa30   :  { %v787_v60 = vmul.f32 %v783_v59, %v1961_v35 }
 0xa32   :  { %v789_v62 = vadd.f32 1e-05, %v787_v60 }
 0xa34   :  { %1846 = vrsqrt.f32 %v789_v62  ;;  %vm797_vm11 = vweird.f32 %v789_v62 }
 0xa37   :  { %v786_v2 = vpop.xlane.xlu1 %785 }
 0xa38   :  { %v788_v6 = vmul.f32 %v786_v2, %v1961_v35 }
 0xa3a   :  { %v1847_v9 = vpop.eup %1846  ;;  %v790_v10 = vadd.f32 1e-05, %v788_v6 }
 0xa3b   :  { %v792_v11 = vmul.f32 %v1847_v9, %v789_v62  ;;  %vm798_vm10 = vweird.f32 %v1847_v9 }
 0xa3c   :  { %1848 = vrsqrt.f32 %v790_v10  ;;  %vm799_vm13 = vmor %vm797_vm11, %vm798_vm10  ;;  %vm807_vm3 = vweird.f32 %v790_v10 }
 0xa3d   :  { %v793_v12 = vmul.f32 %v1847_v9, %v792_v11 }
 0xa3f   :  { %v794_v13 = vmul.f32 0.5, %v793_v12  ;;  %v1807_v12 = vld [vmem:[%s2347_s2 + $0x27] ss:$0 sm:$0xff] }
 0xa41   :  { %v795_v14 = vsub.f32 1.5, %v794_v13 }
 0xa42   :  { %v1849_v15 = vpop.eup %1848 }
 0xa43   :  { %v796_v16 = vmul.f32 %v1847_v9, %v795_v14  ;;  %v802_v17 = vmul.f32 %v1849_v15, %v790_v10  ;;  %vm808_vm15 = vweird.f32 %v1849_v15 }
 0xa44   :  { %vm809_vm4 = vmor %vm807_vm3, %vm808_vm15 }
 0xa45   :  { %v803_v18 = vmul.f32 %v1849_v15, %v802_v17  ;;  %v800_v19 = vsel %vm799_vm13, %v1847_v9, %v796_v16 }
 0xa46   :  { %v811_v26 = vmul.f32 %v800_v19, %v777_v20 }
 0xa47   :  { %v804_v21 = vmul.f32 0.5, %v803_v18 }
 0xa48   :  { %v814_v30 = vmul.f32 %v1800_v24, %v811_v26 }
 0xa49   :  { %v805_v23 = vsub.f32 1.5, %v804_v21 }
 0xa4a   :  { %v817_v33 = vadd.f32 %v1801_v22, %v814_v30 }
 0xa4b   :  { %v806_v28 = vmul.f32 %v1849_v15, %v805_v23 }
 0xa4d   :  { %v810_v29 = vsel %vm809_vm4, %v1849_v15, %v806_v28 }
 0xa4e   :  { %v812_v31 = vmul.f32 %v810_v29, %v778_v25  ;;  %v1803_v25 = vld [vmem:[%s2347_s2 + $0x22] ss:$0 sm:$0xff] }
 0xa50   :  { %v815_v32 = vmul.f32 %v1800_v24, %v812_v31 }
 0xa52   :  { %v818_v27 = vadd.f32 %v1801_v22, %v815_v32 }
 0xa54   :  { %v819_v34 = vpack.c.bf16 %v818_v27, %v817_v33 }
 0xa56   :  { %1625 = vmatmul.msk.bf16.vlgmr.msra.gmra.mxu2 %vm166_vm1, %v819_v34  ;;  %1634 = vmatmul.msk.bf16.vlgmr.msra.gmra.mxu3 %vm166_vm1, %v819_v34 }
 0xa57   :  { %1643 = vmatmul.msk.bf16.vlgmr.msrb.gmra.mxu0 %vm166_vm1, %v819_v34 }
 0xa66   :  { %1654 = vmatmul.msk.bf16.vlgmr.msrb.gmra.mxu3 %vm166_vm1, %v819_v34 }
 0xa67   :  { %1663 = vmatmul.msk.bf16.vlgmr.msra.gmra.mxu0 %vm166_vm1, %v819_v34 }
 0xad4   :  { %v914_v36 = vpop.f32.mrf.mxu0 }
 0xad5   :  { %v915_v42 = vadd.f32 %v1802_v37, %v914_v36 }
 0xad9   :  { %v887_v38 = vpop.f32.mrf.mxu3  ;;  %v860_v39 = vpop.f32.mrf.mxu2 }
 0xada   :  { %v888_v48 = vadd.f32 %v1804_v44, %v887_v38  ;;  %v861_v58 = vadd.f32 %v1803_v25, %v860_v39  ;;  %v1806_v39 = vld [vmem:[%s2347_s2 + $0x23] ss:$0 sm:$0xff] }
 0xadc   :  { %v916_v40 = vpop.f32.mrf.mxu0 }
 0xadd   :  { %v917_v43 = vadd.f32 %v1802_v37, %v916_v40 }
 0xadf   :  { %v968_v46 = vpack.c.bf16 %v917_v43, %v915_v42 }
 0xae1   :  { %979 = vmatpush.bf16.msrb.mxu2 %v968_v46  ;;  %v889_v47 = vpop.f32.mrf.mxu3  ;;  %v862_v52 = vpop.f32.mrf.mxu2 }
 0xae2   :  { %v890_v20 = vadd.f32 %v1804_v44, %v889_v47  ;;  %v863_v54 = vadd.f32 %v1803_v25, %v862_v52 }
 0xae4   :  { %v920_v49 = vpack.c.bf16 %v890_v20, %v888_v48  ;;  %v1050_v50 = vpop.f32.mrf.mxu0  ;;  %v919_v59 = vpack.c.bf16 %v863_v54, %v861_v58 }
 0xae5   :  { %v1051_v62 = vadd.f32 %v1805_v56, %v1050_v50 }
 0xae6   :  { %v925_v53 = vsel %vm326_vm9, %v920_v49, 0 }
 0xae7   :  { %934 = vmatpush.bf16.xpose.msra.mxu1 %v925_v53 }
 0xae9   :  { %v1023_v36 = vpop.f32.mrf.mxu3 }
 0xaea   :  { %v1024_v42 = vadd.f32 %v1806_v39, %v1023_v36 }
 0xaec   :  { %v1052_v60 = vpop.f32.mrf.mxu0 }
 0xaed   :  { %v1053_v63 = vadd.f32 %v1805_v56, %v1052_v60 }
 0xaee   :  { %1644 = vmatmul.msk.bf16.vlgmr.msra.gmra.mxu1 %vm326_vm9, %v919_v59 }
 0xaef   :  { %1074 = vmatpush.bf16.msrb.mxu1 %v1763_v51  ;;  %v1083_v0 = vpack.c.bf16 %v1053_v63, %v1051_v62 }
 0xaf1   :  { %v1088_v1 = vsel %vm326_vm9, %v1083_v0, 0  ;;  %v1025_v38 = vpop.f32.mrf.mxu3 }
 0xaf2   :  { %1097 = vmatpush.bf16.xpose.msra.mxu2 %v1088_v1  ;;  %v1026_v40 = vadd.f32 %v1806_v39, %v1025_v38  ;;  %v1767_v38 = vld [vmem:[%s2345_s1 + $0x178] sm:$0xff] }
 0xaf3   :  { %1075 = vmatpush.bf16.msrb.mxu1 %v1762_v55 }
 0xaf4   :  { %v1082_v43 = vpack.c.bf16 %v1026_v40, %v1024_v42 }
 0xaf7   :  { %1279 = vmatpush.bf16.msra.mxu1 %v1767_v38 }
 0xafe   :  { %1672 = vmatmul.msk.bf16.vlgmr.msrb.gmra.mxu1 %vm166_vm1, %v819_v34 }
 0xb6b   :  { %v936_v2 = vpop.f32.mrf.mxu1 }
 0xb6c   :  { %v941_v4 = vmul.f32 0.25, %v936_v2 }
 0xb6e   :  { %v943_v5 = vsel %vm2045_vm14, %v941_v4, -1e+30 }
 0xb6f   :  { %v945_v6 = vsel %vm326_vm9, %v943_v5, -inf }
 0xb70   :  { %946 = vmax.xlane.f32.xlu2 %v945_v6 }
 0xb73   :  { %v938_v7 = vpop.f32.mrf.mxu1 }
 0xb74   :  { %v942_v8 = vmul.f32 0.25, %v938_v7  ;;  %v1765_v7 = vld [vmem:[%s2345_s1 + $0x168] sm:$0xff] }
 0xb75   :  { %1186 = vmatpush.bf16.msrb.mxu0 %v1765_v7  ;;  %v1770_v7 = vld [vmem:[%s2345_s1 + $0x190] sm:$0xff] }
 0xb76   :  { %v944_v9 = vsel %vm2054_vm2, %v942_v8, -1e+30 }
 0xb77   :  { %v948_v10 = vsel %vm326_vm9, %v944_v9, -inf }
 0xb78   :  { %949 = vmax.xlane.f32.xlu1 %v948_v10 }
 0xb7b   :  { %v1077_v11 = vpop.f32.mrf.mxu1 }
 0xb7c   :  { %v1078_v14 = vadd.f32 %v1807_v12, %v1077_v11  ;;  %v1764_v11 = vld [vmem:[%s2345_s1 + $0x160] sm:$0xff] }
 0xb7d   :  { %1187 = vmatpush.bf16.msrb.mxu0 %v1764_v11  ;;  %v1768_v11 = vld [vmem:[%s2345_s1 + $0x180] sm:$0xff] }
 0xb83   :  { %v1079_v13 = vpop.f32.mrf.mxu1 }
 0xb84   :  { %v1080_v15 = vadd.f32 %v1807_v12, %v1079_v13 }
 0xb86   :  { %v1131_v16 = vpack.c.bf16 %v1080_v15, %v1078_v14 }
 0xb88   :  { %1142 = vmatpush.bf16.msra.mxu3 %v1131_v16 }
 0xbe3   :  { %v947_v17 = vpop.xlane.xlu2 %946 }
 0xbe4   :  { %v951_v18 = vsub.f32 %v943_v5, %v947_v17 }
 0xbe6   :  { %v953_v19 = vmul.f32 1.442695, %v951_v18  ;;  %v1808_v18 = vld [vmem:[%s2347_s2 + $0x28] ss:$0 sm:$0xff] }
 0xbe8   :  { %1850 = vpow2.f32 %v953_v19 }
 0xbeb   :  { %v950_v21 = vpop.xlane.xlu1 %949 }
 0xbec   :  { %v952_v23 = vsub.f32 %v944_v9, %v950_v21 }
 0xbee   :  { %v1851_v24 = vpop.eup %1850  ;;  %v955_v26 = vmul.f32 1.442695, %v952_v23 }
 0xbef   :  { %v957_v28 = vsel %vm326_vm9, %v1851_v24, 0.0 }
 0xbf0   :  { %1852 = vpow2.f32 %v955_v26  ;;  %958 = vadd.xlane.f32.xlu2 %v957_v28 }
 0xbf6   :  { %v1853_v29 = vpop.eup %1852 }
 0xbf7   :  { %v960_v22 = vsel %vm326_vm9, %v1853_v29, 0.0 }
 0xbf8   :  { %961 = vadd.xlane.f32.xlu1 %v960_v22 }
 0xc63   :  { %v959_v30 = vpop.xlane.xlu2 %958 }
 0xc64   :  { %1854 = vrcp.f32 %v959_v30 }
 0xc6a   :  { %v1855_v32 = vpop.eup %1854 }
 0xc6b   :  { %v962_v31 = vpop.xlane.xlu1 %961  ;;  %v965_v27 = vmul.f32 %v1855_v32, %v1851_v24 }
 0xc6c   :  { %1856 = vrcp.f32 %v962_v31 }
 0xc72   :  { %v1857_v33 = vpop.eup %1856 }
 0xc73   :  { %v966_v34 = vmul.f32 %v1857_v33, %v1853_v29 }
 0xc75   :  { %v967_v37 = vpack.c.bf16 %v966_v34, %v965_v27 }
 0xc77   :  { %1645 = vmatmul.msk.bf16.vlgmr.msrb.gmra.mxu2 %vm326_vm9, %v967_v37 }
 0xc87   :  { %1673 = vmatmul.msk.bf16.vlgmr.msra.gmra.mxu2 %vm326_vm9, %v1082_v43  ;;  %v1766_v43 = vld [vmem:[%s2345_s1 + $0x170] sm:$0xff] }
 0xc88   :  { %1280 = vmatpush.bf16.msra.mxu1 %v1766_v43 }
 0xcfa   :  { %v981_v44 = vpop.f32.mrf.mxu2 }
 0xd02   :  { %v983_v46 = vpop.f32.mrf.mxu2 }
 0xd0a   :  { %v1099_v47 = vpop.f32.mrf.mxu2 }
 0xd0b   :  { %v1104_v48 = vmul.f32 0.25, %v1099_v47 }
 0xd0d   :  { %v1106_v20 = vsel %vm2045_vm14, %v1104_v48, -1e+30 }
 0xd0e   :  { %v1108_v49 = vsel %vm326_vm9, %v1106_v20, -inf }
 0xd0f   :  { %1109 = vmax.xlane.f32.xlu2 %v1108_v49 }
 0xd12   :  { %v1101_v50 = vpop.f32.mrf.mxu2 }
 0xd13   :  { %v1105_v51 = vmul.f32 0.25, %v1101_v50 }
 0xd15   :  { %v1107_v52 = vsel %vm2054_vm2, %v1105_v51, -1e+30 }
 0xd16   :  { %v1111_v25 = vsel %vm326_vm9, %v1107_v52, -inf }
 0xd17   :  { %1112 = vmax.xlane.f32.xlu1 %v1111_v25 }
 0xd82   :  { %v1110_v53 = vpop.xlane.xlu2 %1109 }
 0xd83   :  { %v1114_v54 = vsub.f32 %v1106_v20, %v1110_v53 }
 0xd85   :  { %v1116_v55 = vmul.f32 1.442695, %v1114_v54 }
 0xd87   :  { %1858 = vpow2.f32 %v1116_v55 }
 0xd8a   :  { %v1113_v56 = vpop.xlane.xlu1 %1112 }
 0xd8b   :  { %v1115_v58 = vsub.f32 %v1107_v52, %v1113_v56 }
 0xd8d   :  { %v1859_v59 = vpop.eup %1858  ;;  %v1118_v61 = vmul.f32 1.442695, %v1115_v58 }
 0xd8e   :  { %v1120_v60 = vsel %vm326_vm9, %v1859_v59, 0.0 }
 0xd8f   :  { %1860 = vpow2.f32 %v1118_v61  ;;  %1121 = vadd.xlane.f32.xlu2 %v1120_v60 }
 0xd95   :  { %v1861_v62 = vpop.eup %1860 }
 0xd96   :  { %v1123_v63 = vsel %vm326_vm9, %v1861_v62, 0.0 }
 0xd97   :  { %1124 = vadd.xlane.f32.xlu1 %v1123_v63  ;;  %v1810_v63 = vld [vmem:[%s2347_s2 + $0x2a] ss:$0 sm:$0xff] }
 0xe02   :  { %v1122_v3 = vpop.xlane.xlu2 %1121 }
 0xe03   :  { %1862 = vrcp.f32 %v1122_v3 }
 0xe09   :  { %v1863_v1 = vpop.eup %1862 }
 0xe0a   :  { %v1125_v0 = vpop.xlane.xlu1 %1124  ;;  %v1128_v4 = vmul.f32 %v1863_v1, %v1859_v59  ;;  %v1809_v59 = vld [vmem:[%s2347_s2 + $0x29] ss:$0 sm:$0xff] }
 0xe0b   :  { %1864 = vrcp.f32 %v1125_v0 }
 0xe11   :  { %v1865_v2 = vpop.eup %1864 }
 0xe12   :  { %v1129_v5 = vmul.f32 %v1865_v2, %v1861_v62 }
 0xe14   :  { %v1130_v6 = vpack.c.bf16 %v1129_v5, %v1128_v4 }
 0xe16   :  { %1674 = vmatmul.msk.bf16.vlgmr.msra.gmra.mxu3 %vm326_vm9, %v1130_v6  ;;  %v1771_v6 = vld [vmem:[%s2345_s1 + $0x198] sm:$0xff] }
 0xe17   :  { %1346 = vmatpush.bf16.msrb.mxu2 %v1771_v6 }
 0xe1b   :  { %1347 = vmatpush.bf16.msrb.mxu2 %v1770_v7 }
 0xe99   :  { %v1144_v8 = vpop.f32.mrf.mxu3 }
 0xea1   :  { %v1146_v9 = vpop.f32.mrf.mxu3 }
 0xea2   :  { %v1782_v10 = vpack.i.bf16 %v1146_v9, %v1144_v8  ;;  %v1769_v8 = vld [vmem:[%s2345_s1 + $0x188] sm:$0xff] }
 0xea3   :  { %v1811_v9 = vld [vmem:[%s2347_s2 + $0x2b] ss:$0 sm:$0xff]  ;;  %1348 = vmatpush.bf16.msrb.mxu2 %v1769_v8 }
 0xea4   :  { %1783 = vrot.lane.b32.xlu2 %v1782_v10, %s1879_s5 }
 0xea7   :  { %1349 = vmatpush.bf16.msrb.mxu2 %v1768_v11 }
 0xefe   :  { %v1784_v12 = vpop.permute.xlu2 %1783 }
 0xeff   :  { %v1786_v13 = vunpack.i.h.bf16 %v1784_v12  ;;  %v1785_v14 = vunpack.i.l.bf16 %v1784_v12 }
 0xf01   :  { %v1158_v15 = vsel %vm326_vm9, %v983_v46, %v1786_v13  ;;  %v1157_v16 = vsel %vm326_vm9, %v981_v44, %v1785_v14 }
 0xf02   :  { %v1164_v17 = vpack.c.bf16 %v1158_v15, %v1157_v16 }
 0xf04   :  { %1683 = vmatmul.msk.bf16.vlgmr.msrb.gmra.mxu0 %vm166_vm1, %v1164_v17 }
 0xf81   :  { %v1189_v19 = vpop.f32.mrf.mxu0 }
 0xf82   :  { %v1194_v21 = vadd.f32 %v1189_v19, %v2145_v41 }
 0xf84   :  { %v2264_v23 = vadd.f32 %v1808_v18, %v1194_v21 }
 0xf86   :  { %v1201_v24 = vsel %vm166_vm1, %v2264_v23, 0.0 }
 0xf87   :  { %1202 = vadd.xlane.f32.xlu0 %v1201_v24 }
 0xf89   :  { %v1191_v26 = vpop.f32.mrf.mxu0 }
 0xf8a   :  { %v1195_v28 = vadd.f32 %v1191_v26, %v2150_v45 }
 0xf8c   :  { %v2269_v29 = vadd.f32 %v1808_v18, %v1195_v28 }
 0xf8e   :  { %v1204_v22 = vsel %vm166_vm1, %v2269_v29, 0.0 }
 0xf8f   :  { %1205 = vadd.xlane.f32.xlu1 %v1204_v22 }
 0xffa   :  { %v1203_v30 = vpop.xlane.xlu0 %1202 }
 0xffb   :  { %v1207_v31 = vmul.f32 %v1203_v30, %v1961_v35 }
 0xffd   :  { %v1209_v41 = vsub.f32 %v2264_v23, %v1207_v31 }
 0xfff   :  { %v1211_v32 = vmul.f32 %v1209_v41, %v1209_v41 }
0x1001   :  { %v1213_v33 = vsel %vm166_vm1, %v1211_v32, 0.0 }
0x1002   :  { %1214 = vadd.xlane.f32.xlu0 %v1213_v33  ;;  %v1206_v27 = vpop.xlane.xlu1 %1205 }
0x1003   :  { %v1208_v34 = vmul.f32 %v1206_v27, %v1961_v35 }
0x1005   :  { %v1210_v45 = vsub.f32 %v2269_v29, %v1208_v34 }
0x1007   :  { %v1212_v36 = vmul.f32 %v1210_v45, %v1210_v45 }
0x1009   :  { %v1216_v37 = vsel %vm166_vm1, %v1212_v36, 0.0 }
0x100a   :  { %1217 = vadd.xlane.f32.xlu1 %v1216_v37  ;;  %v1812_v37 = vld [vmem:[%s2347_s2 + $0x2c] ss:$0 sm:$0xff] }
0x1075   :  { %v1215_v39 = vpop.xlane.xlu0 %1214 }
0x1076   :  { %v1219_v40 = vmul.f32 %v1215_v39, %v1961_v35 }
0x1078   :  { %v1221_v42 = vadd.f32 1e-05, %v1219_v40 }
0x107a   :  { %1866 = vrsqrt.f32 %v1221_v42  ;;  %vm1229_vm2 = vweird.f32 %v1221_v42 }
0x107d   :  { %v1218_v44 = vpop.xlane.xlu1 %1217 }
0x107e   :  { %v1220_v46 = vmul.f32 %v1218_v44, %v1961_v35 }
0x1080   :  { %v1867_v47 = vpop.eup %1866  ;;  %v1222_v48 = vadd.f32 1e-05, %v1220_v46 }
0x1081   :  { %v1224_v20 = vmul.f32 %v1867_v47, %v1221_v42  ;;  %vm1230_vm14 = vweird.f32 %v1867_v47 }
0x1082   :  { %1868 = vrsqrt.f32 %v1222_v48  ;;  %vm1231_vm5 = vmor %vm1229_vm2, %vm1230_vm14  ;;  %vm1239_vm7 = vweird.f32 %v1222_v48 }
0x1083   :  { %v1225_v49 = vmul.f32 %v1867_v47, %v1224_v20 }
0x1085   :  { %v1226_v50 = vmul.f32 0.5, %v1225_v49 }
0x1087   :  { %v1227_v51 = vsub.f32 1.5, %v1226_v50 }
0x1088   :  { %v1869_v52 = vpop.eup %1868 }
0x1089   :  { %v1228_v25 = vmul.f32 %v1867_v47, %v1227_v51  ;;  %v1234_v53 = vmul.f32 %v1869_v52, %v1222_v48  ;;  %vm1240_vm6 = vweird.f32 %v1869_v52 }
0x108a   :  { %vm1241_vm8 = vmor %vm1239_vm7, %vm1240_vm6 }
0x108b   :  { %v1235_v54 = vmul.f32 %v1869_v52, %v1234_v53  ;;  %v1232_v55 = vsel %vm1231_vm5, %v1867_v47, %v1228_v25 }
0x108c   :  { %v1243_v61 = vmul.f32 %v1232_v55, %v1209_v41 }
0x108d   :  { %v1236_v56 = vmul.f32 0.5, %v1235_v54 }
0x108e   :  { %v1246_v3 = vmul.f32 %v1809_v59, %v1243_v61  ;;  %v1773_v61 = vld [vmem:[%s2345_s1 + $0x1a8] sm:$0xff] }
0x108f   :  { %v1237_v58 = vsub.f32 1.5, %v1236_v56  ;;  %1463 = vmatpush.bf16.msra.mxu0 %v1773_v61 }
0x1090   :  { %v1249_v2 = vadd.f32 %v1810_v63, %v1246_v3 }
0x1091   :  { %v1238_v60 = vmul.f32 %v1869_v52, %v1237_v58 }
0x1093   :  { %v1242_v62 = vsel %vm1241_vm8, %v1869_v52, %v1238_v60 }
0x1094   :  { %v1244_v0 = vmul.f32 %v1242_v62, %v1210_v45 }
0x1096   :  { %v1247_v1 = vmul.f32 %v1809_v59, %v1244_v0 }
0x1098   :  { %v1250_v4 = vadd.f32 %v1810_v63, %v1247_v1 }
0x109a   :  { %v1256_v5 = vpack.c.bf16 %v1250_v4, %v1249_v2 }
0x109c   :  { %1692 = vmatmul.msk.bf16.vlgmr.msra.gmra.mxu1 %vm166_vm1, %v1256_v5 }
0x1119   :  { %v1282_v10 = vpop.f32.mrf.mxu1 }
0x111a   :  { %v1283_v12 = vadd.f32 %v1811_v9, %v1282_v10  ;;  %v1813_v10 = vld [vmem:[%s2347_s2 + $0x8] ss:$0 sm:$0xff] }
0x111c   :  { %v1287_v13 = vmul.f32 %v1283_v12, %v1283_v12 }
0x111e   :  { %v1289_v14 = vmul.f32 %v1287_v13, %v1283_v12 }
0x1120   :  { %v1291_v15 = vmul.f32 0.044715, %v1289_v14 }
0x1121   :  { %v1284_v16 = vpop.f32.mrf.mxu1 }
0x1122   :  { %v1293_v17 = vadd.f32 %v1291_v15, %v1283_v12  ;;  %v1285_v18 = vadd.f32 %v1811_v9, %v1284_v16  ;;  %v1814_v15 = vld [vmem:[%s2347_s2 + $0x9] ss:$0 sm:$0xff] }
0x1124   :  { %v1295_v19 = vmul.f32 0.7978846, %v1293_v17  ;;  %v1288_v21 = vmul.f32 %v1285_v18, %v1285_v18  ;;  %v1880_v17 = vmov 0.0  }
0x1126   :  { %v1290_v24 = vmul.f32 %v1288_v21, %v1285_v18  ;;  %1870 = vtanh.f32 %v1295_v19 }
0x1128   :  { %v1292_v26 = vmul.f32 0.044715, %v1290_v24 }
0x112a   :  { %v1294_v28 = vadd.f32 %v1292_v26, %v1285_v18 }
0x112c   :  { %v1296_v22 = vmul.f32 0.7978846, %v1294_v28  ;;  %v1871_v30 = vpop.eup %1870  ;;  %v1772_v28 = vld [vmem:[%s2345_s1 + $0x1a0] sm:$0xff] }
0x112d   :  { %v1299_v31 = vadd.f32 1.0, %v1871_v30  ;;  %1464 = vmatpush.bf16.msra.mxu0 %v1772_v28 }
0x112e   :  { %1872 = vtanh.f32 %v1296_v22 }
0x112f   :  { %v1301_v32 = vmul.f32 0.5, %v1299_v31 }
0x1131   :  { %v1303_v34 = vmul.f32 %v1301_v32, %v1283_v12 }
0x1134   :  { %v1873_v41 = vpop.eup %1872 }
0x1135   :  { %v1300_v33 = vadd.f32 1.0, %v1873_v41 }
0x1137   :  { %v1302_v27 = vmul.f32 0.5, %v1300_v33 }
0x1139   :  { %v1304_v45 = vmul.f32 %v1302_v27, %v1285_v18  ;;  %v1415_v18 = vsel %vm2039_vm12, 1.0, %v1880_v17 }
0x113a   :  { %v1416_v26 = vpack.c.bf16 %v1415_v18, %v1415_v18 }
0x113b   :  { %v1314_v36 = vpack.c.bf16 %v1304_v45, %v1303_v34 }
0x113d   :  { %1709 = vmatmul.msk.bf16.vlgmr.msrb.gmra.mxu2 %vm118_vm0, %v1314_v36 }
0x11c0   :  { %v1351_v38 = vpop.f32.mrf.mxu2 }
0x11c1   :  { %v1356_v39 = vadd.f32 %v1351_v38, %v2264_v23 }
0x11c3   :  { %v1359_v40 = vadd.f32 %v1812_v37, %v1356_v39 }
0x11c5   :  { %v1363_v42 = vsel %vm166_vm1, %v1359_v40, 0.0 }
0x11c6   :  { %1364 = vadd.xlane.f32.xlu0 %v1363_v42 }
0x11c8   :  { %v1353_v43 = vpop.f32.mrf.mxu2 }
0x11c9   :  { %v1357_v44 = vadd.f32 %v1353_v43, %v2269_v29 }
0x11cb   :  { %v1360_v46 = vadd.f32 %v1812_v37, %v1357_v44 }
0x11cd   :  { %v1366_v47 = vsel %vm166_vm1, %v1360_v46, 0.0 }
0x11ce   :  { %1367 = vadd.xlane.f32.xlu1 %v1366_v47 }
0x1239   :  { %v1365_v48 = vpop.xlane.xlu0 %1364 }
0x123a   :  { %v1369_v20 = vmul.f32 %v1365_v48, %v1961_v35 }
0x123c   :  { %v1371_v49 = vsub.f32 %v1359_v40, %v1369_v20 }
0x123e   :  { %v1373_v50 = vmul.f32 %v1371_v49, %v1371_v49 }
0x1240   :  { %v1375_v51 = vsel %vm166_vm1, %v1373_v50, 0.0 }
0x1241   :  { %1376 = vadd.xlane.f32.xlu2 %v1375_v51  ;;  %v1368_v23 = vpop.xlane.xlu1 %1367 }
0x1242   :  { %v1370_v52 = vmul.f32 %v1368_v23, %v1961_v35 }
0x1244   :  { %v1372_v25 = vsub.f32 %v1360_v46, %v1370_v52 }
0x1246   :  { %v1374_v53 = vmul.f32 %v1372_v25, %v1372_v25 }
0x1248   :  { %v1378_v54 = vsel %vm166_vm1, %v1374_v53, 0.0 }
0x1249   :  { %1379 = vadd.xlane.f32.xlu0 %v1378_v54 }
0x12b4   :  { %v1377_v29 = vpop.xlane.xlu2 %1376 }
0x12b5   :  { %v1381_v55 = vmul.f32 %v1377_v29, %v1961_v35 }
0x12b7   :  { %v1383_v56 = vadd.f32 1e-05, %v1381_v55 }
0x12b9   :  { %1874 = vrsqrt.f32 %v1383_v56  ;;  %vm1391_vm10 = vweird.f32 %v1383_v56 }
0x12bc   :  { %v1380_v58 = vpop.xlane.xlu0 %1379 }
0x12bd   :  { %v1382_v59 = vmul.f32 %v1380_v58, %v1961_v35 }
0x12bf   :  { %v1875_v60 = vpop.eup %1874  ;;  %v1384_v62 = vadd.f32 1e-05, %v1382_v59 }
0x12c0   :  { %v1386_v63 = vmul.f32 %v1875_v60, %v1383_v56  ;;  %vm1392_vm0 = vweird.f32 %v1875_v60 }
0x12c1   :  { %1876 = vrsqrt.f32 %v1384_v62  ;;  %vm1393_vm11 = vmor %vm1391_vm10, %vm1392_vm0  ;;  %vm1401_vm15 = vweird.f32 %v1384_v62 }
0x12c2   :  { %v1387_v3 = vmul.f32 %v1875_v60, %v1386_v63 }
0x12c4   :  { %v1388_v0 = vmul.f32 0.5, %v1387_v3 }
0x12c6   :  { %v1389_v1 = vsub.f32 1.5, %v1388_v0 }
0x12c7   :  { %v1877_v2 = vpop.eup %1876 }
0x12c8   :  { %v1390_v4 = vmul.f32 %v1875_v60, %v1389_v1  ;;  %v1396_v5 = vmul.f32 %v1877_v2, %v1384_v62  ;;  %vm1402_vm13 = vweird.f32 %v1877_v2 }
0x12c9   :  { %vm1403_vm3 = vmor %vm1401_vm15, %vm1402_vm13 }
0x12ca   :  { %v1397_v6 = vmul.f32 %v1877_v2, %v1396_v5  ;;  %v1394_v35 = vsel %vm1393_vm11, %v1875_v60, %v1390_v4 }
0x12cb   :  { %v1405_v9 = vmul.f32 %v1394_v35, %v1371_v49 }
0x12cc   :  { %v1398_v7 = vmul.f32 0.5, %v1397_v6 }
0x12cd   :  { %v1408_v14 = vmul.f32 %v1813_v10, %v1405_v9 }
0x12ce   :  { %v1399_v8 = vsub.f32 1.5, %v1398_v7 }
0x12cf   :  { %v1411_v19 = vadd.f32 %v1814_v15, %v1408_v14 }
0x12d0   :  { %v1400_v11 = vmul.f32 %v1877_v2, %v1399_v8 }
0x12d2   :  { %v1404_v12 = vsel %vm1403_vm3, %v1877_v2, %v1400_v11 }
0x12d3   :  { %v1406_v13 = vmul.f32 %v1404_v12, %v1372_v25 }
0x12d5   :  { %v1409_v16 = vmul.f32 %v1813_v10, %v1406_v13 }
0x12d7   :  { %v1412_v21 = vadd.f32 %v1814_v15, %v1409_v16 }
0x12d9   :  { %v1417_v24 = vpack.c.bf16 %v1412_v21, %v1411_v19 }
0x12db   :  { %1428 = vmatpush.bf16.msrb.mxu3 %v1417_v24 }
0x12de   :  { %1710 = vmatmul.msk.bf16.vlgmr.msrb.gmra.mxu3 %vm326_vm9, %v1416_v26 }
0x1361   :  { %v1430_v22 = vpop.f32.mrf.mxu3 }
0x1362   :  { %v1434_v30 = vmul.f32 0.2, %v1430_v22 }
0x1364   :  { %v1440_v31 = vpack.c.bf16 %v1434_v30, %v1434_v30 }
0x1366   :  { %1719 = vmatmul.msk.bf16.vlgmr.msra.gmra.mxu0 %vm166_vm1, %v1440_v31 }
0x1369   :  { %v1432_v41 = vpop.f32.mrf.mxu3 }
0x13e3   :  { %v1466_v32 = vpop.f32.mrf.mxu0 }
0x13e4   :  { %v1467_v33 = vadd.f32 %v1815_v57, %v1466_v32 }
0x13e6   :  { %1470 = vst [vmem:[%s2348_s3] sm:$0xff] %v1467_v33 }
0x13eb   :  { %v1468_v27 = vpop.f32.mrf.mxu0 }

</bundles_post_ra>
